<compile_context>
chip_gen: v5e
topology: v5e:2x2
jax: 0.10.0
libtpu: 0.0.40
codegen_flags: <defaults>
</compile_context>

<pallas_src>
import inspect
import math

import jax
import jax.numpy as jnp
from jax.experimental import pallas as pl
from jax.experimental.pallas import tpu as pltpu


# ----------------------------------------------------------------------------
# Fused kernel: per (batch, channel-tile) block, run the whole cascade.
# Inputs arrive in native (TD, L_i) layout and are transposed in-kernel (XLU) to
# time-major (L_i, TD) so TD sits on the 128-wide lane axis for all matmuls and
# every output is written directly in the module's (B, L_i, D) layout.
# ----------------------------------------------------------------------------
def _make_fused_kernel(n_scales, matmul_dtype, approximate_gelu):
    """n_scales = len(season_list) = num_reduce + 1."""
    n = n_scales
    inv_sqrt2 = 1.0 / math.sqrt(2.0)
    c_tanh = math.sqrt(2.0 / math.pi)

    def gelu(h):
        if approximate_gelu:   # tanh approx routes through the EUP slot
            return 0.5 * h * (1.0 + jnp.tanh(
                jnp.float32(c_tanh) * (h + jnp.float32(0.044715) * h * h * h)))
        # exact erf GELU == torch.nn.GELU() default
        return 0.5 * h * (1.0 + jax.lax.erf(h * jnp.float32(inv_sqrt2)))

    def kernel(*refs):
        s_refs = refs[:n]                      # inputs  (1, TD, L_i), native layout
        p_refs = refs[n:n + 4 * (n - 1)]       # (w1, b1, w2, b2) per level
        o_refs = refs[n + 4 * (n - 1):]        # outputs (1, L_i, TD), n of them

        def load_time_major(i):
            # native (TD, L_i) tile -> time-major (L_i, TD), f32 working copy
            return jnp.transpose(s_refs[i][0, :, :], (1, 0)).astype(jnp.float32)

        out_high = load_time_major(0)                        # (L0, TD)
        # out_season_list[0] is just season_list[0].permute(0, 2, 1)
        o_refs[0][0, :, :] = out_high.astype(o_refs[0].dtype)
        out_low = load_time_major(1)                         # (L1, TD)

        for i in range(n - 1):
            w1 = p_refs[4 * i + 0][...]                      # (L_{i+1}, L_i), matmul dtype
            b1 = p_refs[4 * i + 1][...].astype(jnp.float32)  # (L_{i+1}, 1)
            w2 = p_refs[4 * i + 2][...]                      # (L_{i+1}, L_{i+1})
            b2 = p_refs[4 * i + 3][...].astype(jnp.float32)  # (L_{i+1}, 1)

            # torch:  out_low_res = Linear2(GELU(Linear1(out_high)))  (acting on L)
            # time-major:  h = W1 @ out_high + b1 ;  y = W2 @ h + b2  (f32 accum)
            h = jnp.dot(w1, out_high.astype(matmul_dtype),
                        preferred_element_type=jnp.float32) + b1
            h = gelu(h)
            y = jnp.dot(w2, h.astype(matmul_dtype),
                        preferred_element_type=jnp.float32) + b2

            out_low = out_low + y                            # residual add (f32)
            out_high = out_low
            o_refs[i + 1][0, :, :] = out_high.astype(o_refs[i + 1].dtype)
            if i + 2 <= n - 1:
                out_low = load_time_major(i + 2)

    return kernel


# ----------------------------------------------------------------------------
# Generation-aware VMEM budget & channel-tile selection.
# ----------------------------------------------------------------------------
def _vmem_budget_bytes():
    cap = 64 * 1024 * 1024            # conservative fallback (v7x per-TC VMEM)
    try:
        info = pltpu.get_tpu_info()
        cap = int(getattr(info, "vmem_capacity_bytes", cap))
    except Exception:
        pass
    return int(0.70 * cap)            # leave headroom for compiler-internal buffers


# Grid-invariant weight blocks do not need double-buffering: single-buffer them
# when this JAX exposes pipeline_mode (halves resident parameter VMEM).
_WEIGHT_SPEC_KW = {}
if hasattr(pl, "Buffered"):
    try:
        if "pipeline_mode" in inspect.signature(pl.BlockSpec).parameters:
            _WEIGHT_SPEC_KW = {"pipeline_mode": pl.Buffered(1)}
    except (TypeError, ValueError):
        pass


def _choose_tile_d(d, b, max_tile_d, vmem_need_fn, vmem_budget):
    """Largest 128-multiple divisor of D that fits the VMEM budget (<= max_tile_d)."""
    if d % 128 == 0:
        cands = [t for t in range(d, 0, -128) if d % t == 0]   # descending
    else:
        cands = [d]          # non-128-multiple D: single full-extent block only
    capped = [t for t in cands if t <= max_tile_d] or [cands[-1]]
    fits = [t for t in capped if vmem_need_fn(t) <= vmem_budget] or [capped[-1]]
    td = fits[0]
    # v7x megacore: keep >= 2 grid programs when we can afford it.
    if b * (d // td) < 2:
        multi = [t for t in fits if d // t >= 2]
        if multi:
            td = multi[0]
    return td


# ----------------------------------------------------------------------------
# Public wrapper: MultiScaleSeasonMixing.forward
# ----------------------------------------------------------------------------
def multi_scale_season_mixing(params, season_list, *, max_tile_d=2048,
                              matmul_dtype=jnp.bfloat16, approximate_gelu=False):
    """MultiScaleSeasonMixing.forward.

    params      : list of (w1, b1, w2, b2) per level, PyTorch layout:
                  w1 (L_{i+1}, L_i), b1 (L_{i+1},), w2 (L_{i+1}, L_{i+1}), b2 (L_{i+1},)
    season_list : list of (B, D, L_i), L_i = seq_len // down_factor**i  (module layout)
    returns     : list of (B, L_i, D)  (same as the PyTorch module)
    """
    n = len(season_list)
    assert n >= 2 and len(params) == n - 1
    B, D, _ = season_list[0].shape
    Ls = [int(s.shape[2]) for s in season_list]
    dtype = season_list[0].dtype
    itemsize = jnp.dtype(dtype).itemsize

    # PyTorch-layout weights pre-cast to the MXU dtype (halves weight HBM/VMEM
    # for bf16); biases kept as f32 column vectors for time-major broadcast.
    flat_params = []
    for (w1, b1, w2, b2) in params:
        flat_params += [w1.astype(matmul_dtype),
                        b1.reshape(-1, 1).astype(jnp.float32),
                        w2.astype(matmul_dtype),
                        b2.reshape(-1, 1).astype(jnp.float32)]
    param_bytes = sum(int(p.size) * jnp.dtype(p.dtype).itemsize for p in flat_params)
    weight_bufs = 1 if _WEIGHT_SPEC_KW else 2

    budget = _vmem_budget_bytes()

    def vmem_need(td):
        act = sum(td * L * itemsize for L in Ls)      # one set of in (or out) tiles
        work = 6 * td * Ls[0] * 4                     # f32 working values in the body
        return 2 * act + 2 * act + weight_bufs * param_bytes + work

    TD = _choose_tile_d(D, B, max_tile_d, vmem_need, budget)
    n_d = D // TD
    grid = (B, n_d)

    # --- specs ----------------------------------------------------------------
    in_specs = []
    for L in Ls:   # native-layout season inputs: contiguous (TD, L_i) chunks
        in_specs.append(pl.BlockSpec((1, TD, L), lambda b, d: (b, d, 0)))
    for p in flat_params:   # grid-invariant weights/biases: VMEM-resident
        in_specs.append(pl.BlockSpec(p.shape, lambda b, d: (0, 0), **_WEIGHT_SPEC_KW))

    out_shape = tuple(jax.ShapeDtypeStruct((B, L, D), dtype) for L in Ls)
    out_specs = tuple(pl.BlockSpec((1, L, TD), lambda b, d: (b, 0, d)) for L in Ls)

    # --- scheduling hints -------------------------------------------------------
    flops = sum(2 * B * D * (Ls[i] * Ls[i + 1] + Ls[i + 1] * Ls[i + 1])
                for i in range(n - 1))
    transcendentals = sum(B * D * Ls[i + 1] for i in range(n - 1))
    bytes_accessed = 2 * sum(B * D * L * itemsize for L in Ls) + param_bytes

    vmem_limit = int(min(budget, max(2 * vmem_need(TD), 32 * 1024 * 1024)))

    result = pl.pallas_call(
        _make_fused_kernel(n, matmul_dtype, approximate_gelu),
        grid=grid,
        in_specs=in_specs,
        out_specs=out_specs,
        out_shape=out_shape,
        compiler_params=pltpu.CompilerParams(
            dimension_semantics=("parallel", "parallel"),
            vmem_limit_bytes=vmem_limit),
        cost_estimate=pl.CostEstimate(
            flops=int(flops), transcendentals=int(transcendentals),
            bytes_accessed=int(bytes_accessed)),
    )(*season_list, *flat_params)

    return list(result)


# ----------------------------------------------------------------------------
# Parameter init (deterministic, mimics PyTorch nn.Linear default uniform init)
# Weights are kept in PyTorch (out_features, in_features) layout.
# ----------------------------------------------------------------------------
def init_params(key, seq_len, down_factor, num_reduce, dtype=jnp.float32):
    params = []
    for i in range(num_reduce):
        l_in = seq_len // down_factor ** i
        l_out = seq_len // down_factor ** (i + 1)
        key, k1, k2, k3, k4 = jax.random.split(key, 5)
        bound1 = 1.0 / math.sqrt(l_in)
        bound2 = 1.0 / math.sqrt(l_out)
        w1 = jax.random.uniform(k1, (l_out, l_in), dtype, -bound1, bound1)
        b1 = jax.random.uniform(k2, (l_out,), dtype, -bound1, bound1)
        w2 = jax.random.uniform(k3, (l_out, l_out), dtype, -bound2, bound2)
        b2 = jax.random.uniform(k4, (l_out,), dtype, -bound2, bound2)
        params.append((w1, b1, w2, b2))
    return params


# ----------------------------------------------------------------------------
# Pure-JAX reference (silent correctness check vs. the module semantics)
# ----------------------------------------------------------------------------
def _ref_forward(params, season_list):
    hp = jax.lax.Precision.HIGHEST

    def mlp(x, w1, b1, w2, b2):
        h = jnp.einsum("bdl,ol->bdo", x, w1, precision=hp) + b1
        h = 0.5 * h * (1.0 + jax.lax.erf(h * jnp.float32(1.0 / math.sqrt(2.0))))
        return jnp.einsum("bdl,ol->bdo", h, w2, precision=hp) + b2

    out_high = season_list[0]
    out_low = season_list[1]
    outs = [jnp.transpose(out_high, (0, 2, 1))]
    n = len(season_list)
    for i in range(n - 1):
        w1, b1, w2, b2 = params[i]
        out_low = out_low + mlp(out_high, w1, b1, w2, b2)
        out_high = out_low
        if i + 2 <= n - 1:
            out_low = season_list[i + 2]
        outs.append(jnp.transpose(out_high, (0, 2, 1)))
    return outs


if __name__ == "__main__":
    # Small TimeMixer-style config: seq_len=32, down_factor=2, num_reduce=2,
    # batch=2, d_model (channels) = 256  ->  season_list shapes
    #   (2, 256, 32), (2, 256, 16), (2, 256, 8)
    seq_len, down_factor, num_reduce = 32, 2, 2
    B, D = 2, 256

    key = jax.random.PRNGKey(0)
    key, pkey = jax.random.split(key)
    params = init_params(pkey, seq_len, down_factor, num_reduce)

    season_list = []
    for i in range(num_reduce + 1):
        key, sk = jax.random.split(key)
        L_i = seq_len // down_factor ** i
        season_list.append(jax.random.normal(sk, (B, D, L_i), jnp.float32))

    refs = _ref_forward(params, season_list)
    ref_scale = max(float(jnp.max(jnp.abs(r))) for r in refs)

    # 1) Default perf path: bf16 MXU matmuls, full-D channel tile -> grid (B, 1) = (2, 1).
    outs = multi_scale_season_mixing(params, season_list)
    outs = [jax.block_until_ready(o) for o in outs]
    for o, r in zip(outs, refs):
        assert o.shape == r.shape, (o.shape, r.shape)
        err = float(jnp.max(jnp.abs(o - r)))
        assert err < 2e-2 * (ref_scale + 1.0), ("bf16 path", err)

    # 2) f32 MXU path with a tiled channel grid (TD=128 -> grid (2, 2)): exact parity.
    outs32 = multi_scale_season_mixing(params, season_list,
                                       matmul_dtype=jnp.float32, max_tile_d=128)
    outs32 = [jax.block_until_ready(o) for o in outs32]
    for o, r in zip(outs32, refs):
        assert o.shape == r.shape, (o.shape, r.shape)
        err = float(jnp.max(jnp.abs(o - r)))
        assert err < 1e-3 * (ref_scale + 1.0), ("f32 path", err)

    print("KERNEL_OK")
</pallas_src>

<mosaic_0001>
module attributes {stable_mosaic.version = 11 : i64} {
  func.func @kernel(%arg0: i32, %arg1: i32, %arg2: memref<1x256x32xf32, #tpu.memory_space<vmem>>, %arg3: memref<1x256x16xf32, #tpu.memory_space<vmem>>, %arg4: memref<1x256x8xf32, #tpu.memory_space<vmem>>, %arg5: memref<16x32xbf16, #tpu.memory_space<vmem>>, %arg6: memref<16x1xf32, #tpu.memory_space<vmem>>, %arg7: memref<16x16xbf16, #tpu.memory_space<vmem>>, %arg8: memref<16x1xf32, #tpu.memory_space<vmem>>, %arg9: memref<8x16xbf16, #tpu.memory_space<vmem>>, %arg10: memref<8x1xf32, #tpu.memory_space<vmem>>, %arg11: memref<8x8xbf16, #tpu.memory_space<vmem>>, %arg12: memref<8x1xf32, #tpu.memory_space<vmem>>, %arg13: memref<1x32x256xf32, #tpu.memory_space<vmem>>, %arg14: memref<1x16x256xf32, #tpu.memory_space<vmem>>, %arg15: memref<1x8x256xf32, #tpu.memory_space<vmem>>) attributes {dimension_semantics = [#tpu.dimension_semantics<parallel>, #tpu.dimension_semantics<parallel>], iteration_bounds = array<i64: 2, 1>, scalar_prefetch = 0 : i64, scratch_operands = 0 : i64, tpu.core_type = #tpu.core_type<tc>, window_params = [{transform_indices = @transform_0, window_bounds = array<i64: 1, 256, 32>}, {transform_indices = @transform_1, window_bounds = array<i64: 1, 256, 16>}, {transform_indices = @transform_2, window_bounds = array<i64: 1, 256, 8>}, {pipeline_mode = #tpu.pipeline_mode<synchronous>, transform_indices = @transform_3, window_bounds = array<i64: 16, 32>}, {pipeline_mode = #tpu.pipeline_mode<synchronous>, transform_indices = @transform_4, window_bounds = array<i64: 16, 1>}, {pipeline_mode = #tpu.pipeline_mode<synchronous>, transform_indices = @transform_5, window_bounds = array<i64: 16, 16>}, {pipeline_mode = #tpu.pipeline_mode<synchronous>, transform_indices = @transform_6, window_bounds = array<i64: 16, 1>}, {pipeline_mode = #tpu.pipeline_mode<synchronous>, transform_indices = @transform_7, window_bounds = array<i64: 8, 16>}, {pipeline_mode = #tpu.pipeline_mode<synchronous>, transform_indices = @transform_8, window_bounds = array<i64: 8, 1>}, {pipeline_mode = #tpu.pipeline_mode<synchronous>, transform_indices = @transform_9, window_bounds = array<i64: 8, 8>}, {pipeline_mode = #tpu.pipeline_mode<synchronous>, transform_indices = @transform_10, window_bounds = array<i64: 8, 1>}, {transform_indices = @transform_11, window_bounds = array<i64: 1, 32, 256>}, {transform_indices = @transform_12, window_bounds = array<i64: 1, 16, 256>}, {transform_indices = @transform_13, window_bounds = array<i64: 1, 8, 256>}]} {
    %c0 = arith.constant 0 : index
    %c0_0 = arith.constant 0 : index
    %c0_1 = arith.constant 0 : index
    %0 = vector.load %arg2[%c0, %c0_0, %c0_1] : memref<1x256x32xf32, #tpu.memory_space<vmem>>, vector<1x256x32xf32>
    %1 = vector.shape_cast %0 : vector<1x256x32xf32> to vector<256x32xf32>
    %2 = tpu.transpose %1, [1, 0] : vector<256x32xf32> -> vector<32x256xf32>
    %c0_2 = arith.constant 0 : index
    %c0_3 = arith.constant 0 : index
    %c0_4 = arith.constant 0 : index
    %3 = vector.load %arg13[%c0_2, %c0_3, %c0_4] : memref<1x32x256xf32, #tpu.memory_space<vmem>>, vector<1x32x256xf32>
    %4 = vector.shape_cast %3 : vector<1x32x256xf32> to vector<32x256xf32>
    %5 = vector.shape_cast %2 : vector<32x256xf32> to vector<1x32x256xf32>
    tpu.vector_store %arg13[%c0_2, %c0_3, %c0_4], %5 {strides = array<i32>} : memref<1x32x256xf32, #tpu.memory_space<vmem>>, vector<1x32x256xf32>,
    %c0_5 = arith.constant 0 : index
    %c0_6 = arith.constant 0 : index
    %c0_7 = arith.constant 0 : index
    %6 = vector.load %arg3[%c0_5, %c0_6, %c0_7] : memref<1x256x16xf32, #tpu.memory_space<vmem>>, vector<1x256x16xf32>
    %7 = vector.shape_cast %6 : vector<1x256x16xf32> to vector<256x16xf32>
    %8 = tpu.transpose %7, [1, 0] : vector<256x16xf32> -> vector<16x256xf32>
    %c0_8 = arith.constant 0 : index
    %c0_9 = arith.constant 0 : index
    %9 = vector.load %arg5[%c0_8, %c0_9] : memref<16x32xbf16, #tpu.memory_space<vmem>>, vector<16x32xbf16>
    %c0_10 = arith.constant 0 : index
    %c0_11 = arith.constant 0 : index
    %10 = vector.load %arg6[%c0_10, %c0_11] : memref<16x1xf32, #tpu.memory_space<vmem>>, vector<16x1xf32>
    %c0_12 = arith.constant 0 : index
    %c0_13 = arith.constant 0 : index
    %11 = vector.load %arg7[%c0_12, %c0_13] : memref<16x16xbf16, #tpu.memory_space<vmem>>, vector<16x16xbf16>
    %c0_14 = arith.constant 0 : index
    %c0_15 = arith.constant 0 : index
    %12 = vector.load %arg8[%c0_14, %c0_15] : memref<16x1xf32, #tpu.memory_space<vmem>>, vector<16x1xf32>
    %13 = arith.truncf %2 : vector<32x256xf32> to vector<32x256xbf16>
    %cst = arith.constant dense<0.000000e+00> : vector<16x256xf32>
    %14 = tpu.matmul %9, %13, %cst {dimension_numbers = #tpu.dot_dimension_numbers<[1], [0], [0], [1], [0, 0, 1, 1], [], []>} : vector<16x32xbf16>, vector<32x256xbf16>, vector<16x256xf32> -> vector<16x256xf32>
    %15 = vector.broadcast %10 : vector<16x1xf32> to vector<16x256xf32>
    %16 = arith.addf %14, %15 : vector<16x256xf32>
    %cst_16 = arith.constant 5.000000e-01 : f32
    %17 = vector.broadcast %cst_16 : f32 to vector<16x256xf32>
    %18 = arith.mulf %17, %16 : vector<16x256xf32>
    %cst_17 = arith.constant 0.707106769 : f32
    %19 = vector.broadcast %cst_17 : f32 to vector<16x256xf32>
    %20 = arith.mulf %16, %19 : vector<16x256xf32>
    %21 = math.erf %20 : vector<16x256xf32>
    %cst_18 = arith.constant 1.000000e+00 : f32
    %22 = vector.broadcast %cst_18 : f32 to vector<16x256xf32>
    %23 = arith.addf %22, %21 : vector<16x256xf32>
    %24 = arith.mulf %18, %23 : vector<16x256xf32>
    %25 = arith.truncf %24 : vector<16x256xf32> to vector<16x256xbf16>
    %cst_19 = arith.constant dense<0.000000e+00> : vector<16x256xf32>
    %26 = tpu.matmul %11, %25, %cst_19 {dimension_numbers = #tpu.dot_dimension_numbers<[1], [0], [0], [1], [0, 0, 1, 1], [], []>} : vector<16x16xbf16>, vector<16x256xbf16>, vector<16x256xf32> -> vector<16x256xf32>
    %27 = vector.broadcast %12 : vector<16x1xf32> to vector<16x256xf32>
    %28 = arith.addf %26, %27 : vector<16x256xf32>
    %29 = arith.addf %8, %28 : vector<16x256xf32>
    %c0_20 = arith.constant 0 : index
    %c0_21 = arith.constant 0 : index
    %c0_22 = arith.constant 0 : index
    %30 = vector.load %arg14[%c0_20, %c0_21, %c0_22] : memref<1x16x256xf32, #tpu.memory_space<vmem>>, vector<1x16x256xf32>
    %31 = vector.shape_cast %30 : vector<1x16x256xf32> to vector<16x256xf32>
    %32 = vector.shape_cast %29 : vector<16x256xf32> to vector<1x16x256xf32>
    tpu.vector_store %arg14[%c0_20, %c0_21, %c0_22], %32 {strides = array<i32>} : memref<1x16x256xf32, #tpu.memory_space<vmem>>, vector<1x16x256xf32>,
    %c0_23 = arith.constant 0 : index
    %c0_24 = arith.constant 0 : index
    %c0_25 = arith.constant 0 : index
    %33 = vector.load %arg4[%c0_23, %c0_24, %c0_25] : memref<1x256x8xf32, #tpu.memory_space<vmem>>, vector<1x256x8xf32>
    %34 = vector.shape_cast %33 : vector<1x256x8xf32> to vector<256x8xf32>
    %35 = tpu.transpose %34, [1, 0] : vector<256x8xf32> -> vector<8x256xf32>
    %c0_26 = arith.constant 0 : index
    %c0_27 = arith.constant 0 : index
    %36 = vector.load %arg9[%c0_26, %c0_27] : memref<8x16xbf16, #tpu.memory_space<vmem>>, vector<8x16xbf16>
    %c0_28 = arith.constant 0 : index
    %c0_29 = arith.constant 0 : index
    %37 = vector.load %arg10[%c0_28, %c0_29] : memref<8x1xf32, #tpu.memory_space<vmem>>, vector<8x1xf32>
    %c0_30 = arith.constant 0 : index
    %c0_31 = arith.constant 0 : index
    %38 = vector.load %arg11[%c0_30, %c0_31] : memref<8x8xbf16, #tpu.memory_space<vmem>>, vector<8x8xbf16>
    %c0_32 = arith.constant 0 : index
    %c0_33 = arith.constant 0 : index
    %39 = vector.load %arg12[%c0_32, %c0_33] : memref<8x1xf32, #tpu.memory_space<vmem>>, vector<8x1xf32>
    %40 = arith.truncf %29 : vector<16x256xf32> to vector<16x256xbf16>
    %cst_34 = arith.constant dense<0.000000e+00> : vector<8x256xf32>
    %41 = tpu.matmul %36, %40, %cst_34 {dimension_numbers = #tpu.dot_dimension_numbers<[1], [0], [0], [1], [0, 0, 1, 1], [], []>} : vector<8x16xbf16>, vector<16x256xbf16>, vector<8x256xf32> -> vector<8x256xf32>
    %42 = vector.broadcast %37 : vector<8x1xf32> to vector<8x256xf32>
    %43 = arith.addf %41, %42 : vector<8x256xf32>
    %cst_35 = arith.constant 5.000000e-01 : f32
    %44 = vector.broadcast %cst_35 : f32 to vector<8x256xf32>
    %45 = arith.mulf %44, %43 : vector<8x256xf32>
    %cst_36 = arith.constant 0.707106769 : f32
    %46 = vector.broadcast %cst_36 : f32 to vector<8x256xf32>
    %47 = arith.mulf %43, %46 : vector<8x256xf32>
    %48 = math.erf %47 : vector<8x256xf32>
    %cst_37 = arith.constant 1.000000e+00 : f32
    %49 = vector.broadcast %cst_37 : f32 to vector<8x256xf32>
    %50 = arith.addf %49, %48 : vector<8x256xf32>
    %51 = arith.mulf %45, %50 : vector<8x256xf32>
    %52 = arith.truncf %51 : vector<8x256xf32> to vector<8x256xbf16>
    %cst_38 = arith.constant dense<0.000000e+00> : vector<8x256xf32>
    %53 = tpu.matmul %38, %52, %cst_38 {dimension_numbers = #tpu.dot_dimension_numbers<[1], [0], [0], [1], [0, 0, 1, 1], [], []>} : vector<8x8xbf16>, vector<8x256xbf16>, vector<8x256xf32> -> vector<8x256xf32>
    %54 = vector.broadcast %39 : vector<8x1xf32> to vector<8x256xf32>
    %55 = arith.addf %53, %54 : vector<8x256xf32>
    %56 = arith.addf %35, %55 : vector<8x256xf32>
    %c0_39 = arith.constant 0 : index
    %c0_40 = arith.constant 0 : index
    %c0_41 = arith.constant 0 : index
    %57 = vector.load %arg15[%c0_39, %c0_40, %c0_41] : memref<1x8x256xf32, #tpu.memory_space<vmem>>, vector<1x8x256xf32>
    %58 = vector.shape_cast %57 : vector<1x8x256xf32> to vector<8x256xf32>
    %59 = vector.shape_cast %56 : vector<8x256xf32> to vector<1x8x256xf32>
    tpu.vector_store %arg15[%c0_39, %c0_40, %c0_41], %59 {strides = array<i32>} : memref<1x8x256xf32, #tpu.memory_space<vmem>>, vector<1x8x256xf32>,
    return
  }
  func.func @transform_0(%arg0: i32, %arg1: i32) -> (i32, i32, i32) {
    %c0_i32 = arith.constant 0 : i32
    %c0_i32_0 = arith.constant 0 : i32
    return %arg0, %arg1, %c0_i32 : i32, i32, i32
  }
  func.func @transform_1(%arg0: i32, %arg1: i32) -> (i32, i32, i32) {
    %c0_i32 = arith.constant 0 : i32
    %c0_i32_0 = arith.constant 0 : i32
    return %arg0, %arg1, %c0_i32 : i32, i32, i32
  }
  func.func @transform_2(%arg0: i32, %arg1: i32) -> (i32, i32, i32) {
    %c0_i32 = arith.constant 0 : i32
    %c0_i32_0 = arith.constant 0 : i32
    return %arg0, %arg1, %c0_i32 : i32, i32, i32
  }
  func.func @transform_3(%arg0: i32, %arg1: i32) -> (i32, i32) {
    %c0_i32 = arith.constant 0 : i32
    %c0_i32_0 = arith.constant 0 : i32
    %c0_i32_1 = arith.constant 0 : i32
    return %c0_i32, %c0_i32_0 : i32, i32
  }
  func.func @transform_4(%arg0: i32, %arg1: i32) -> (i32, i32) {
    %c0_i32 = arith.constant 0 : i32
    %c0_i32_0 = arith.constant 0 : i32
    %c0_i32_1 = arith.constant 0 : i32
    return %c0_i32, %c0_i32_0 : i32, i32
  }
  func.func @transform_5(%arg0: i32, %arg1: i32) -> (i32, i32) {
    %c0_i32 = arith.constant 0 : i32
    %c0_i32_0 = arith.constant 0 : i32
    %c0_i32_1 = arith.constant 0 : i32
    return %c0_i32, %c0_i32_0 : i32, i32
  }
  func.func @transform_6(%arg0: i32, %arg1: i32) -> (i32, i32) {
    %c0_i32 = arith.constant 0 : i32
    %c0_i32_0 = arith.constant 0 : i32
    %c0_i32_1 = arith.constant 0 : i32
    return %c0_i32, %c0_i32_0 : i32, i32
  }
  func.func @transform_7(%arg0: i32, %arg1: i32) -> (i32, i32) {
    %c0_i32 = arith.constant 0 : i32
    %c0_i32_0 = arith.constant 0 : i32
    %c0_i32_1 = arith.constant 0 : i32
    return %c0_i32, %c0_i32_0 : i32, i32
  }
  func.func @transform_8(%arg0: i32, %arg1: i32) -> (i32, i32) {
    %c0_i32 = arith.constant 0 : i32
    %c0_i32_0 = arith.constant 0 : i32
    %c0_i32_1 = arith.constant 0 : i32
    return %c0_i32, %c0_i32_0 : i32, i32
  }
  func.func @transform_9(%arg0: i32, %arg1: i32) -> (i32, i32) {
    %c0_i32 = arith.constant 0 : i32
    %c0_i32_0 = arith.constant 0 : i32
    %c0_i32_1 = arith.constant 0 : i32
    return %c0_i32, %c0_i32_0 : i32, i32
  }
  func.func @transform_10(%arg0: i32, %arg1: i32) -> (i32, i32) {
    %c0_i32 = arith.constant 0 : i32
    %c0_i32_0 = arith.constant 0 : i32
    %c0_i32_1 = arith.constant 0 : i32
    return %c0_i32, %c0_i32_0 : i32, i32
  }
  func.func @transform_11(%arg0: i32, %arg1: i32) -> (i32, i32, i32) {
    %c0_i32 = arith.constant 0 : i32
    %c0_i32_0 = arith.constant 0 : i32
    return %arg0, %c0_i32, %arg1 : i32, i32, i32
  }
  func.func @transform_12(%arg0: i32, %arg1: i32) -> (i32, i32, i32) {
    %c0_i32 = arith.constant 0 : i32
    %c0_i32_0 = arith.constant 0 : i32
    return %arg0, %c0_i32, %arg1 : i32, i32, i32
  }
  func.func @transform_13(%arg0: i32, %arg1: i32) -> (i32, i32, i32) {
    %c0_i32 = arith.constant 0 : i32
    %c0_i32_0 = arith.constant 0 : i32
    return %arg0, %c0_i32, %arg1 : i32, i32, i32
  }
}

</mosaic_0001>

<bundles_post_ra>
// kernel: tpu_custom_call.1
= control target key start
LH: loop header
LB: loop body
LE: loop exit
PB: predicated region body
PF: predicated region fallthrough
CT: control target
= control target key end

     0   :  { %s2394_s0 = inlined_call_operand.vmem [shape: f32[2,256,32], index: 0, kind: input, shape index: {}]   ;;  %s2395_s1 = inlined_call_operand.vmem [shape: f32[2,256,16], index: 1, kind: input, shape index: {}]   ;;  %s2396_s2 = inlined_call_operand.vmem [shape: f32[2,256,8], index: 2, kind: input, shape index: {}]   ;;  %s2397_s3 = inlined_call_operand.vmem [shape: bf16[16,32], index: 3, kind: input, shape index: {}]   ;;  %s2398_s4 = inlined_call_operand.vmem [shape: f32[16,1], index: 4, kind: input, shape index: {}]   ;;  %s2399_s5 = inlined_call_operand.vmem [shape: bf16[16,16], index: 5, kind: input, shape index: {}]   ;;  %s2400_s6 = inlined_call_operand.vmem [shape: f32[16,1], index: 6, kind: input, shape index: {}]   ;;  %s2401_s7 = inlined_call_operand.vmem [shape: bf16[8,16], index: 7, kind: input, shape index: {}]   ;;  %s2402_s8 = inlined_call_operand.vmem [shape: f32[8,1], index: 8, kind: input, shape index: {}]   ;;  %s2403_s9 = inlined_call_operand.vmem [shape: bf16[8,8], index: 9, kind: input, shape index: {}]   ;;  %s2404_s10 = inlined_call_operand.vmem [shape: f32[8,1], index: 10, kind: input, shape index: {}]   ;;  %s2405_s11 = inlined_call_operand.hbm [shape: f32[2,32,256], index: 11, kind: output, shape index: {0}]   ;;  %s2406_s12 = inlined_call_operand.hbm [shape: f32[2,16,256], index: 12, kind: output, shape index: {1}]   ;;  %s2407_s13 = inlined_call_operand.hbm [shape: f32[2,8,256], index: 13, kind: output, shape index: {2}]  }
   0x1   :  { %2410 = sst [smem:[#allocation9_spill]] %s2394_s0 }
   0x2   :  { %2411 = sst [smem:[#allocation10_spill]] %s2395_s1 }
   0x3   :  { %2412 = sst [smem:[#allocation11_spill]] %s2396_s2 }
   0x4   :  { %2413 = sst [smem:[#allocation12_spill]] %s2397_s3 }
   0x5   :  { %2414 = sst [smem:[#allocation13_spill]] %s2398_s4 }
   0x6   :  { %2415 = sst [smem:[#allocation14_spill]] %s2399_s5 }
   0x7   :  { %2416 = sst [smem:[#allocation15_spill]] %s2400_s6 }
   0x8   :  { %2417 = sst [smem:[#allocation16_spill]] %s2401_s7 }
   0x9   :  { %2418 = sst [smem:[#allocation17_spill]] %s2402_s8 }
   0xa   :  { %2419 = sst [smem:[#allocation18_spill]] %s2403_s9 }
   0xb   :  { %2420 = sst [smem:[#allocation19_spill]] %s2404_s10 }
   0xc   :  { %19 = vsyncpa [#allocation3], 0 }
   0xd   :  { %21 = vsyncpa [#allocation3 + $0x1], 0 }
   0xe   :  { %22 = vsyncpa [#allocation5], 0 }
   0xf   :  { %24 = vsyncpa [#allocation5 + $0x1], 0  ;;  %s1930_s25 = smov 0   ;;  %s1932_s26 = smov 0  }
  0x10   :  { %s1934_s27 = smov 0   ;;  %s1936_s28 = smov 0  }
  0x11   :  { %s1938_s29 = smov 0   ;;  %s1940_s30 = smov 0  }
  0x12 LB: > { %s2409_s14 = sadd.s32 4294967295, %s1855_s30   ;;  %s2408_s15 = sadd.s32 4294967294, %s1855_s30   ;;  %s1855_s30 = sphi %s1940_s30, %s30_s30   ;;  %s1851_s29 = sphi %s1938_s29, %s2444_s29   ;;  %s1847_s28 = sphi %s1936_s28, %s2443_s28   ;;  %s1843_s27 = sphi %s1934_s27, %s2442_s27   ;;  %s1839_s26 = sphi %s1932_s26, %s2441_s26   ;;  %s1835_s25 = sphi %s1930_s25, %s2440_s25  }
  0x13   : > { %s42_s16 = sadd.s32 1, %s1851_s29  ;;  %s303_s17 = sadd.s32 1, %s1843_s27 }
  0x14   : > { %p44_p0 = scmp.ge.s32.totalorder %s42_s16, 2  ;;  %p313_p1 = scmp.ne.s32.totalorder %s1843_s27, %s1839_s26 }
  0x15   : > { %p314_p2 = scmp.eq.s32.totalorder %s2409_s14, 1  ;;  %p319_p3 = scmp.ne.s32.totalorder %s1839_s26, %s1835_s25 }
  0x16   : > { %s2446_s16 = smov (%p44_p0, %s42_s16), 0  ;;  %p320_p5 = scmp.eq.s32.totalorder %s2408_s15, 1 }
  0x17   : > { %p1972_p4 = por %p314_p2, %p313_p1  ;;  %s298_s19 = ssub.s32 %s1851_s29, %s2446_s16 }
  0x18   : > { %p1583_p6 = scmp.ge.s32.totalorder %s1855_s30, 1  ;;  %p301_p7 = scmp.eq.s32.totalorder %s298_s19, 0 }
  0x19   : > { %p1981_p8 = por %p320_p5, %p319_p3  ;;  %p457_p9 = scmp.lt.s32.totalorder %s1855_s30, 3 }
  0x1a   : > { %s1987_s21 = scalar_select %p301_p7, %s1843_s27, %s303_s17  }
  0x1b   : > { %p458_p10 = pnand %p1583_p6, %p457_p9 }
  0x1c   : > { %p534_p11 = scmp.lt.s32.totalorder (!%p458_p10), %s1847_s28, 1  ;;  %s2423_s0 = sld [smem:[#allocation9_spill]] (!%p458_p10) }
  0x1d   : > { %461 = sbr.rel (%p458_p10) target bundleno = 907 (0x38b), region = 64  ;;  %s2032_s15 = sand.u32 (!%p458_p10), 1, %s1839_s26  }
  0x1e   : > { %s1584_s17 = sshll.u32 (!%p458_p10), %s2032_s15, 6  ;;  %s2424_s4 = sld [smem:[#allocation13_spill]] (!%p458_p10) }
  0x1f   : > { %s2425_s6 = sld [smem:[#allocation15_spill]] (!%p458_p10) }
  0x20   : > { %s2426_s3 = sld [smem:[#allocation12_spill]] (!%p458_p10) }
  0x21   : > { %s2427_s1 = sld [smem:[#allocation10_spill]] (!%p458_p10) }
  0x22   : > { %s535_s22 = scalar_select %p534_p11, %s1847_s28, 1  ;;  %v1857_v35 = vmov 0   ;;  %vm794_vm0 = vcmask 261120  }
  0x23   : > { %1702 = vset.pattern.permute.xlu2 %v1857_v35  ;;  %s2430_s5 = sld [smem:[#allocation14_spill]] }
  0x24   : > { %s1991_s23 = sshll.u32 %s535_s22, 8  ;;  %s2035_s22 = scalar_lea.vmem [#allocation2], %s1584_s17  ;;  %v769_v34 = vld [vmem:[%s2424_s4] sm:$0xff]  ;;  %v770_v38 = vld [vmem:[%s2424_s4 + $0x8] sm:$0xff] }
  0x25   : > { %s1997_s19 = scalar_lea.vmem %s2423_s0, %s1991_s23  ;;  %781 = vperm.xlu2 %1702, %v769_v34   ;;  %v773_v41 = vld [vmem:[%s2425_s6] sm:$0xff]  ;;  %v774_v46 = vld [vmem:[%s2425_s6 + $0x8] sm:$0xff]  ;;  %s2431_s8 = sld [smem:[#allocation17_spill]] }
  0x26   : > { %v583_v0 = vld [vmem:[%s1997_s19 + $0x80] sm:$0xff]  ;;  %v584_v2 = vld [vmem:[%s1997_s19 + $0x88] sm:$0xff]  ;;  %v585_v4 = vld [vmem:[%s1997_s19 + $0x90] sm:$0xff]  ;;  %s1585_s17 = sshll.u32 %s2032_s15, 5  ;;  %s2432_s7 = sld [smem:[#allocation16_spill]] }
  0x27   : > { %v567_v1 = vld [vmem:[%s1997_s19] sm:$0xff]  ;;  %631 = vxpose.xlu1.b32.start [1/16] (narrow) %v583_v0, 32  ;;  %v568_v3 = vld [vmem:[%s1997_s19 + $0x8] sm:$0xff]  ;;  %v569_v5 = vld [vmem:[%s1997_s19 + $0x10] sm:$0xff]  ;;  %s2070_s14 = scalar_lea.vmem %s2427_s1, %s1991_s23  ;;  %s2227_s24 = scalar_lea.vmem [#allocation4], %s1585_s17 }
  0x28   : > { %599 = vxpose.xlu0.b32.start [1/16] (narrow) %v567_v1, 32  ;;  %v586_v6 = vld [vmem:[%s1997_s19 + $0x98] sm:$0xff]  ;;  %v587_v8 = vld [vmem:[%s1997_s19 + $0xa0] sm:$0xff]  ;;  %v588_v10 = vld [vmem:[%s1997_s19 + $0xa8] sm:$0xff]  ;;  %s2433_s2 = sld [smem:[#allocation11_spill]]  ;;  %s1375_s17 = sshll.u32 %s2227_s24, 4  ;;  %s1376_s17 = int_to_ptr.vmem [resolvable:$true] %s1375_s17 }
  0x29   : > { %v570_v7 = vld [vmem:[%s1997_s19 + $0x18] sm:$0xff]  ;;  %v571_v9 = vld [vmem:[%s1997_s19 + $0x20] sm:$0xff]  ;;  %v572_v11 = vld [vmem:[%s1997_s19 + $0x28] sm:$0xff]  ;;  %s2434_s10 = sld [smem:[#allocation19_spill]]  ;;  %s1356_s6 = sshll.u32 %s2035_s22, 4  ;;  %s1357_s6 = int_to_ptr.vmem [resolvable:$true] %s1356_s6 }
  0x2a   : > { %v589_v12 = vld [vmem:[%s1997_s19 + $0xb0] sm:$0xff]  ;;  %v590_v14 = vld [vmem:[%s1997_s19 + $0xb8] sm:$0xff]  ;;  %v591_v16 = vld [vmem:[%s1997_s19 + $0xc0] sm:$0xff]  ;;  %s2435_s9 = sld [smem:[#allocation18_spill]] }
  0x2b   : > { %v573_v13 = vld [vmem:[%s1997_s19 + $0x30] sm:$0xff]  ;;  %v574_v15 = vld [vmem:[%s1997_s19 + $0x38] sm:$0xff]  ;;  %v575_v17 = vld [vmem:[%s1997_s19 + $0x40] sm:$0xff] }
  0x2c   : > { %v592_v18 = vld [vmem:[%s1997_s19 + $0xc8] sm:$0xff]  ;;  %v593_v20 = vld [vmem:[%s1997_s19 + $0xd0] sm:$0xff]  ;;  %v594_v22 = vld [vmem:[%s1997_s19 + $0xd8] sm:$0xff] }
  0x2d   : > { %v576_v19 = vld [vmem:[%s1997_s19 + $0x48] sm:$0xff]  ;;  %v577_v21 = vld [vmem:[%s1997_s19 + $0x50] sm:$0xff]  ;;  %v578_v23 = vld [vmem:[%s1997_s19 + $0x58] sm:$0xff]  ;;  %786 = vperm.xlu2 %1702, %v770_v38  }
  0x2e   : > { %v595_v24 = vld [vmem:[%s1997_s19 + $0xe0] sm:$0xff]  ;;  %v596_v26 = vld [vmem:[%s1997_s19 + $0xe8] sm:$0xff]  ;;  %v597_v28 = vld [vmem:[%s1997_s19 + $0xf0] sm:$0xff]  ;;  %s2243_s1 = scalar_lea.vmem %s2433_s2, %s1991_s23  ;;  %s1632_s23 = sshll.u32 %s1847_s28, 5 }
  0x2f   : > { %632 = vxpose.xlu1.b32.cont [2/16] (narrow) %v584_v2, 32  ;;  %v579_v25 = vld [vmem:[%s1997_s19 + $0x60] sm:$0xff]  ;;  %v580_v27 = vld [vmem:[%s1997_s19 + $0x68] sm:$0xff]  ;;  %v581_v29 = vld [vmem:[%s1997_s19 + $0x70] sm:$0xff]  ;;  %s2436_s2 = sadd.s32 4294967295, %s1855_s30  }
  0x30   : > { %600 = vxpose.xlu0.b32.cont [2/16] (narrow) %v568_v3, 32  ;;  %v598_v30 = vld [vmem:[%s1997_s19 + $0xf8] sm:$0xff]  ;;  %v1629_v49 = vld [vmem:[%s2426_s3] sm:$0xff]  ;;  %s2308_s3 = sand.u32 1, %s2436_s2  }
  0x31   : > { %v582_v31 = vld [vmem:[%s1997_s19 + $0x78] sm:$0xff]  ;;  %v687_v57 = vld [vmem:[%s2070_s14 + $0x80] sm:$0xff]  ;;  %s1374_s19 = scalar_lea.hbm %s2406_s12, %s1632_s23 }
  0x32   : > { %v671_v60 = vld [vmem:[%s2070_s14] sm:$0xff]  ;;  %s1377_s4 = sshll.u32 %s1374_s19, 4  ;;  %s1378_s4 = int_to_ptr.hbm [resolvable:$true] %s1377_s4 }
  0x35   : > { %1006 = vperm.xlu2 %1702, %v773_v41  }
  0x37   : > { %633 = vxpose.xlu1.b32.cont [3/16] (narrow) %v585_v4, 32 }
  0x38   : > { %601 = vxpose.xlu0.b32.cont [3/16] (narrow) %v569_v5, 32  ;;  %v688_v5 = vld [vmem:[%s2070_s14 + $0x88] sm:$0xff] }
  0x3d   : > { %1011 = vperm.xlu2 %1702, %v774_v46  }
  0x3f   : > { %634 = vxpose.xlu1.b32.cont [4/16] (narrow) %v586_v6, 32 }
  0x40   : > { %602 = vxpose.xlu0.b32.cont [4/16] (narrow) %v570_v7, 32 }
  0x47   : > { %635 = vxpose.xlu1.b32.cont [5/16] (narrow) %v587_v8, 32 }
  0x48   : > { %603 = vxpose.xlu0.b32.cont [5/16] (narrow) %v571_v9, 32  ;;  %v672_v9 = vld [vmem:[%s2070_s14 + $0x8] sm:$0xff] }
  0x4f   : > { %636 = vxpose.xlu1.b32.cont [6/16] (narrow) %v588_v10, 32 }
  0x50   : > { %604 = vxpose.xlu0.b32.cont [6/16] (narrow) %v572_v11, 32 }
  0x57   : > { %637 = vxpose.xlu1.b32.cont [7/16] (narrow) %v589_v12, 32 }
  0x58   : > { %605 = vxpose.xlu0.b32.cont [7/16] (narrow) %v573_v13, 32 }
  0x5f   : > { %638 = vxpose.xlu1.b32.cont [8/16] (narrow) %v590_v14, 32 }
  0x60   : > { %606 = vxpose.xlu0.b32.cont [8/16] (narrow) %v574_v15, 32 }
  0x63   : > { %703 = vxpose.xlu2.b32.start [1/16] (narrow) %v671_v60, 16 }
  0x67   : > { %639 = vxpose.xlu1.b32.cont [9/16] (narrow) %v591_v16, 32 }
  0x68   : > { %607 = vxpose.xlu0.b32.cont [9/16] (narrow) %v575_v17, 32 }
  0x6b   : > { %704 = vxpose.xlu2.b32.cont [2/16] (narrow) %v672_v9, 16 }
  0x6f   : > { %640 = vxpose.xlu1.b32.cont [10/16] (narrow) %v592_v18, 32 }
  0x70   : > { %608 = vxpose.xlu0.b32.cont [10/16] (narrow) %v576_v19, 32 }
  0x77   : > { %641 = vxpose.xlu1.b32.cont [11/16] (narrow) %v593_v20, 32 }
  0x78   : > { %609 = vxpose.xlu0.b32.cont [11/16] (narrow) %v577_v21, 32 }
  0x7f   : > { %642 = vxpose.xlu1.b32.cont [12/16] (narrow) %v594_v22, 32  ;;  %v782_v50 = vpop.permute.xlu2 %781 }
  0x80   : > { %610 = vxpose.xlu0.b32.cont [12/16] (narrow) %v578_v23, 32 }
  0x87   : > { %643 = vxpose.xlu1.b32.cont [13/16] (narrow) %v595_v24, 32  ;;  %v787_v61 = vpop.permute.xlu2 %786  ;;  %v689_v24 = vld [vmem:[%s2070_s14 + $0x90] sm:$0xff] }
  0x88   : > { %611 = vxpose.xlu0.b32.cont [13/16] (narrow) %v579_v25, 32 }
  0x8f   : > { %644 = vxpose.xlu1.b32.cont [14/16] (narrow) %v596_v26, 32 }
  0x90   : > { %612 = vxpose.xlu0.b32.cont [14/16] (narrow) %v580_v27, 32 }
  0x97   : > { %645 = vxpose.xlu1.b32.cont [15/16] (narrow) %v597_v28, 32 }
  0x98   : > { %613 = vxpose.xlu0.b32.cont [15/16] (narrow) %v581_v29, 32 }
  0x9f   : > { %646 = vxpose.xlu1.b32.end [16/16] (narrow) %v598_v30, 32  ;;  %v673_v30 = vld [vmem:[%s2070_s14 + $0x10] sm:$0xff] }
  0xa0   : > { %614 = vxpose.xlu0.b32.end [16/16] (narrow) %v582_v31, 32  ;;  %705 = vxpose.xlu2.b32.cont [3/16] (narrow) %v673_v30, 16 }
  0xa8   : > { %735 = vxpose.xlu0.b32.start [1/16] (narrow) %v687_v57, 16 }
  0xb0   : > { %736 = vxpose.xlu0.b32.cont [2/16] (narrow) %v688_v5, 16 }
  0xb8   : > { %737 = vxpose.xlu0.b32.cont [3/16] (narrow) %v689_v24, 16 }
  0xcb   : > { %v647_v32 = vpop.trf.xlu1 }
  0xcc   : > { %v615_v33 = vpop.trf.xlu0  ;;  %664 = vst [vmem:[%s2035_s22 + $0x8] sm:$0xff] %v647_v32 }
  0xcd   : > { %663 = vst [vmem:[%s2035_s22] sm:$0xff] %v615_v33 }
  0xd3   : > { %v648_v36 = vpop.trf.xlu1 }
  0xd4   : > { %v616_v37 = vpop.trf.xlu0  ;;  %666 = vst [vmem:[%s2035_s22 + $0x18] sm:$0xff] %v648_v36  ;;  %v776_v48 = vpack.c.bf16 %v648_v36, %v647_v32 }
  0xd5   : > { %665 = vst [vmem:[%s2035_s22 + $0x10] sm:$0xff] %v616_v37  ;;  %v775_v47 = vpack.c.bf16 %v616_v37, %v615_v33 }
  0xdb   : > { %v649_v39 = vpop.trf.xlu1 }
  0xdc   : > { %v617_v40 = vpop.trf.xlu0  ;;  %668 = vst [vmem:[%s2035_s22 + $0x28] sm:$0xff] %v649_v39 }
  0xdd   : > { %667 = vst [vmem:[%s2035_s22 + $0x20] sm:$0xff] %v617_v40 }
  0xe3   : > { %v650_v42 = vpop.trf.xlu1 }
  0xe4   : > { %v618_v43 = vpop.trf.xlu0  ;;  %670 = vst [vmem:[%s2035_s22 + $0x38] sm:$0xff] %v650_v42  ;;  %v778_v45 = vpack.c.bf16 %v650_v42, %v649_v39 }
  0xe5   : > { %v777_v44 = vpack.c.bf16 %v618_v43, %v617_v40  ;;  %669 = vst [vmem:[%s2035_s22 + $0x30] sm:$0xff] %v618_v43 }
  0xe6   : > { %818 = vmatpush.bf16.msra.mxu1 %v778_v45 }
  0xe7   : > { %804 = vmatpush.bf16.msra.mxu0 %v777_v44 }
  0xea   : > { %819 = vmatpush.bf16.msra.mxu1 %v776_v48 }
  0xeb   : > { %805 = vmatpush.bf16.msra.mxu0 %v775_v47  ;;  %v690_v47 = vld [vmem:[%s2070_s14 + $0x98] sm:$0xff] }
  0xec   : > { %738 = vxpose.xlu0.b32.cont [4/16] (narrow) %v690_v47, 16 }
  0xed   : > { %1598 = vmatmul.msk.bf16.vlgmr.msra.gmra.mxu1 %vm794_vm0, %v1629_v49 }
  0xee   : > { %1597 = vmatmul.msk.bf16.vlgmr.msra.gmra.mxu0 %vm794_vm0, %v1629_v49 }
  0xf2   : > { %1703 = vset.pattern.permute.xlu1 %v1857_v35 }
 0x16a   : > { %v821_v52 = vpop.f32.mrf.mxu1 }
 0x16b   : > { %v807_v51 = vpop.f32.mrf.mxu0  ;;  %v2064_v54 = vadd.f32 %v821_v52, %v782_v50 }
 0x16c   : > { %v2062_v53 = vadd.f32 %v807_v51, %v782_v50 }
 0x16d   : > { %v2076_v56 = vmul.f32 0.70710677, %v2064_v54 }
 0x16e   : > { %v2073_v55 = vmul.f32 0.70710677, %v2062_v53 }
 0x16f   : > { %v874_v59 = vmul.f32 %v2076_v56, %v2076_v56 }
 0x170   : > { %v834_v58 = vmul.f32 %v2073_v55, %v2073_v55 }
 0x171   : > { %v2086_v63 = vmin.f32 %v874_v59, 16.0 }
 0x172   : > { %v2084_v62 = vmin.f32 %v834_v58, 16.0  ;;  %v823_v1 = vpop.f32.mrf.mxu1 }
 0x173   : > { %v809_v0 = vpop.f32.mrf.mxu0  ;;  %v2091_v4 = vadd.f32 %v823_v1, %v787_v61  ;;  %v887_v7 = vmul.f32 3.8918573e-05, %v2086_v63  ;;  %v876_v13 = vmul.f32 2.1237322e-06, %v2086_v63 }
 0x174   : > { %v836_v2 = vmul.f32 2.1237322e-06, %v2084_v62  ;;  %v2089_v3 = vadd.f32 %v809_v0, %v787_v61  ;;  %v847_v6 = vmul.f32 3.8918573e-05, %v2084_v62 }
 0x175   : > { %v2101_v11 = vmul.f32 0.70710677, %v2091_v4  ;;  %v888_v14 = vadd.f32 0.001143296, %v887_v7  ;;  %v877_v23 = vadd.f32 0.00028619796, %v876_v13 }
 0x176   : > { %v837_v8 = vadd.f32 0.00028619796, %v836_v2  ;;  %v2098_v10 = vmul.f32 0.70710677, %v2089_v3  ;;  %v848_v12 = vadd.f32 0.001143296, %v847_v6 }
 0x177   : > { %v954_v17 = vmul.f32 %v2101_v11, %v2101_v11  ;;  %v889_v19 = vmul.f32 %v888_v14, %v2086_v63  ;;  %v878_v37 = vmul.f32 %v877_v23, %v2086_v63 }
 0x178   : > { %v838_v15 = vmul.f32 %v837_v8, %v2084_v62  ;;  %v914_v16 = vmul.f32 %v2098_v10, %v2098_v10  ;;  %v849_v18 = vmul.f32 %v848_v12, %v2084_v62 }
 0x179   : > { %v2113_v21 = vmin.f32 %v954_v17, 16.0  ;;  %v890_v25 = vadd.f32 0.014752088, %v889_v19  ;;  %v879_v58 = vadd.f32 0.0036580483, %v878_v37 }
 0x17a   : > { %v2111_v20 = vmin.f32 %v914_v16, 16.0  ;;  %v850_v22 = vadd.f32 0.014752088, %v849_v18  ;;  %v839_v26 = vadd.f32 0.0036580483, %v838_v15 }
 0x17b   : > { %v891_v31 = vmul.f32 %v890_v25, %v2086_v63  ;;  %v967_v32 = vmul.f32 3.8918573e-05, %v2113_v21  ;;  %v956_v34 = vmul.f32 2.1237322e-06, %v2113_v21  ;;  %v880_v9 = vmul.f32 %v879_v58, %v2086_v63 }
 0x17c   : > { %v916_v27 = vmul.f32 2.1237322e-06, %v2111_v20  ;;  %v851_v28 = vmul.f32 %v850_v22, %v2084_v62  ;;  %v927_v29 = vmul.f32 3.8918573e-05, %v2111_v20  ;;  %v840_v40 = vmul.f32 %v839_v26, %v2084_v62 }
 0x17d   : > { %v892_v39 = vadd.f32 0.112945676, %v891_v31  ;;  %v968_v43 = vadd.f32 0.001143296, %v967_v32  ;;  %v957_v46 = vadd.f32 0.00028619796, %v956_v34 }
 0x17e   : > { %v917_v33 = vadd.f32 0.00028619796, %v916_v27  ;;  %v852_v36 = vadd.f32 0.112945676, %v851_v28  ;;  %v928_v38 = vadd.f32 0.001143296, %v927_v29 }
 0x17f   : > { %v893_v45 = vmul.f32 %v892_v39, %v2086_v63  ;;  %v969_v49 = vmul.f32 %v968_v43, %v2113_v21  ;;  %v841_v57 = vadd.f32 0.05243302, %v840_v40  ;;  %v958_v1 = vmul.f32 %v957_v46, %v2113_v21 }
 0x180   : > { %v918_v41 = vmul.f32 %v917_v33, %v2111_v20  ;;  %v853_v42 = vmul.f32 %v852_v36, %v2084_v62  ;;  %v929_v44 = vmul.f32 %v928_v38, %v2111_v20  ;;  %v881_v18 = vadd.f32 0.05243302, %v880_v9 }
 0x181   : > { %v894_v52 = vadd.f32 0.4994258, %v893_v45  ;;  %v970_v60 = vadd.f32 0.014752088, %v969_v49  ;;  %v842_v8 = vmul.f32 %v841_v57, %v2084_v62  ;;  %v959_v14 = vadd.f32 0.0036580483, %v958_v1 }
 0x182   : > { %v854_v48 = vadd.f32 0.4994258, %v853_v42  ;;  %v919_v50 = vadd.f32 0.0036580483, %v918_v41  ;;  %v930_v51 = vadd.f32 0.014752088, %v929_v44  ;;  %v882_v31 = vmul.f32 %v881_v18, %v2086_v63 }
 0x183   : > { %v895_v0 = vmul.f32 %v894_v52, %v2086_v63  ;;  %v971_v12 = vmul.f32 %v970_v60, %v2113_v21  ;;  %v843_v17 = vadd.f32 0.18741608, %v842_v8  ;;  %v960_v24 = vmul.f32 %v959_v14, %v2113_v21  ;;  %v691_v52 = vld [vmem:[%s2070_s14 + $0xa0] sm:$0xff]  ;;  %v674_v57 = vld [vmem:[%s2070_s14 + $0x18] sm:$0xff] }
 0x184   : > { %v855_v59 = vmul.f32 %v854_v48, %v2084_v62  ;;  %v931_v61 = vmul.f32 %v930_v51, %v2111_v20  ;;  %v920_v5 = vmul.f32 %v919_v50, %v2111_v20  ;;  %v883_v42 = vadd.f32 0.18741608, %v882_v31  ;;  %739 = vxpose.xlu0.b32.cont [5/16] (narrow) %v691_v52, 16  ;;  %706 = vxpose.xlu2.b32.cont [4/16] (narrow) %v674_v57, 16  ;;  %v677_v52 = vld [vmem:[%s2070_s14 + $0x30] sm:$0xff] }
 0x185   : > { %v2136_v7 = vadd.f32 1.0, %v895_v0  ;;  %v972_v19 = vadd.f32 0.112945676, %v971_v12  ;;  %v844_v30 = vmul.f32 %v843_v17, %v2084_v62  ;;  %v961_v34 = vadd.f32 0.05243302, %v960_v24  ;;  %v683_v12 = vld [vmem:[%s2070_s14 + $0x60] sm:$0xff] }
 0x186   : > { %v856_v2 = vadd.f32 1.0, %v855_v59  ;;  %v932_v6 = vadd.f32 0.112945676, %v931_v61  ;;  %v921_v15 = vadd.f32 0.05243302, %v920_v5  ;;  %v884_v59 = vmul.f32 %v883_v42, %v2086_v63 }
 0x187   : > { %v973_v25 = vmul.f32 %v972_v19, %v2113_v21  ;;  %v845_v41 = vadd.f32 1.1283791, %v844_v30  ;;  %v962_v46 = vmul.f32 %v961_v34, %v2113_v21  ;;  %v908_v63 = vand.u32 2147483648, %v2136_v7 }
 0x188   : > { %1705 = vrcp.f32 %v856_v2  ;;  %v933_v13 = vmul.f32 %v932_v6, %v2111_v20  ;;  %v922_v27 = vmul.f32 %v921_v15, %v2111_v20  ;;  %v868_v40 = vand.u32 2147483648, %v856_v2  ;;  %v692_v15 = vld [vmem:[%s2070_s14 + $0xa8] sm:$0xff] }
 0x189   : > { %1707 = vrcp.f32 %v2136_v7  ;;  %v974_v37 = vadd.f32 0.4994258, %v973_v25  ;;  %v866_v62 = vand.u32 2147483647, %v856_v2  ;;  %vm862_vm2 = vweird.f32 %v856_v2 }
 0x18a   : > { %v934_v16 = vadd.f32 0.4994258, %v933_v13  ;;  %v923_v38 = vadd.f32 0.18741608, %v922_v27  ;;  %v869_v51 = vor.u32 1.1754944e-38, %v868_v40  ;;  %v846_v58 = vmul.f32 %v845_v41, %v2073_v55  ;;  %v676_v40 = vld [vmem:[%s2070_s14 + $0x28] sm:$0xff] }
 0x18b   : > { %v975_v43 = vmul.f32 %v974_v37, %v2113_v21  ;;  %vm867_vm4 = vcmp.eq.f32.partialorder %v866_v62, 8.507059e+37  ;;  %v906_v55 = vand.u32 2147483647, %v2136_v7  ;;  %vm902_vm6 = vweird.f32 %v2136_v7 }
 0x18c   : > { %v935_v22 = vmul.f32 %v934_v16, %v2111_v20  ;;  %v924_v49 = vmul.f32 %v923_v38, %v2111_v20  ;;  %v963_v20 = vadd.f32 0.18741608, %v962_v46  ;;  %v885_v13 = vadd.f32 1.1283791, %v884_v59  ;;  %v675_v16 = vld [vmem:[%s2070_s14 + $0x20] sm:$0xff]  ;;  %740 = vxpose.xlu0.b32.cont [6/16] (narrow) %v692_v15, 16 }
 0x18d   : > { %v2159_v47 = vadd.f32 1.0, %v975_v43  ;;  %vm907_vm12 = vcmp.eq.f32.partialorder %v906_v55, 8.507059e+37  ;;  %707 = vxpose.xlu2.b32.cont [5/16] (narrow) %v675_v16, 16  ;;  %v826_v38 = vmul.f32 0.5, %v2062_v53  ;;  %v828_v41 = vmul.f32 0.5, %v2089_v3  ;;  %v697_v55 = vld [vmem:[%s2070_s14 + $0xd0] sm:$0xff] }
 0x18e   : > { %v1706_v23 = vpop.eup %1705  ;;  %v2149_v29 = vadd.f32 1.0, %v935_v22  ;;  %v964_v17 = vmul.f32 %v963_v20, %v2113_v21  ;;  %v886_v21 = vmul.f32 %v885_v13, %v2076_v56  ;;  %v827_v57 = vmul.f32 0.5, %v2064_v54  ;;  %v695_v20 = vld [vmem:[%s2070_s14 + $0xc0] sm:$0xff]  ;;  %v696_v54 = vld [vmem:[%s2070_s14 + $0xc8] sm:$0xff]  ;;  %v701_v13 = vld [vmem:[%s2070_s14 + $0xf0] sm:$0xff] }
 0x18f   : > { %v2146_v26 = vpop.eup %1707  ;;  %v858_v28 = vmul.f32 %v1706_v23, %v856_v2  ;;  %vm863_vm1 = vweird.f32 %v1706_v23  ;;  %v925_v2 = vadd.f32 1.1283791, %v924_v49  ;;  %vm982_vm14 = vweird.f32 %v2159_v47  ;;  %v702_v15 = vld [vmem:[%s2070_s14 + $0xf8] sm:$0xff]  ;;  %v685_v16 = vld [vmem:[%s2070_s14 + $0x70] sm:$0xff] }
 0x190   : > { %v898_v32 = vmul.f32 %v2146_v26, %v2136_v7  ;;  %1709 = vrcp.f32 %v2149_v29  ;;  %vm864_vm3 = vmor %vm862_vm2, %vm863_vm1  ;;  %vm903_vm5 = vweird.f32 %v2146_v26  ;;  %v946_v5 = vand.u32 2147483647, %v2149_v29 }
 0x191   : > { %v859_v33 = vsub.f32 1.0, %v858_v28  ;;  %1711 = vrcp.f32 %v2159_v47  ;;  %v948_v6 = vand.u32 2147483648, %v2149_v29  ;;  %vm2175_vm8 = vmor %vm902_vm6, %vm903_vm5  ;;  %vm942_vm9 = vweird.f32 %v2149_v29 }
 0x192   : > { %v899_v36 = vsub.f32 1.0, %v898_v32  ;;  %v909_v7 = vor.u32 1.1754944e-38, %v908_v63  ;;  %v926_v22 = vmul.f32 %v925_v2, %v2098_v10  ;;  %vm947_vm11 = vcmp.eq.f32.partialorder %v946_v5, 8.507059e+37  ;;  %v680_v63 = vld [vmem:[%s2070_s14 + $0x48] sm:$0xff]  ;;  %v698_v2 = vld [vmem:[%s2070_s14 + $0xd8] sm:$0xff]  ;;  %v681_v5 = vld [vmem:[%s2070_s14 + $0x50] sm:$0xff] }
 0x193   : > { %v860_v39 = vmul.f32 %v1706_v23, %v859_v33  ;;  %v965_v31 = vadd.f32 1.1283791, %v964_v17  ;;  %v986_v32 = vand.u32 2147483647, %v2159_v47  ;;  %v988_v33 = vand.u32 2147483648, %v2159_v47  ;;  %v686_v17 = vld [vmem:[%s2070_s14 + $0x78] sm:$0xff] }
 0x194   : > { %v900_v45 = vmul.f32 %v2146_v26, %v899_v36  ;;  %vm1019_vm1 = vcmask 130048  }
 0x195   : > { %v861_v44 = vadd.f32 %v1706_v23, %v860_v39  ;;  %v693_v39 = vld [vmem:[%s2070_s14 + $0xb0] sm:$0xff]  ;;  %v966_v62 = vmul.f32 %v965_v31, %v2101_v11  ;;  %vm987_vm0 = vcmp.eq.f32.partialorder %v986_v32, 8.507059e+37  ;;  %708 = vxpose.xlu2.b32.cont [6/16] (narrow) %v676_v40, 16 }
 0x196   : > { %v1710_v48 = vpop.eup %1709  ;;  %v901_v0 = vadd.f32 %v2146_v26, %v900_v45  ;;  %741 = vxpose.xlu0.b32.cont [7/16] (narrow) %v693_v39, 16 }
 0x197   : > { %v865_v50 = vsel %vm864_vm3, %v1706_v23, %v861_v44  ;;  %v938_v60 = vmul.f32 %v1710_v48, %v2149_v29  ;;  %vm943_vm7 = vweird.f32 %v1710_v48  ;;  %v1712_v19 = vpop.eup %1711  ;;  %v949_v23 = vor.u32 1.1754944e-38, %v948_v6  ;;  %v699_v6 = vld [vmem:[%s2070_s14 + $0xe0] sm:$0xff] }
 0x198   : > { %v870_v61 = vsel %vm867_vm4, %v869_v51, %v865_v50  ;;  %v905_v14 = vsel %vm2175_vm8, %v2146_v26, %v901_v0  ;;  %vm944_vm10 = vmor %vm942_vm9, %vm943_vm7  ;;  %v978_v26 = vmul.f32 %v1712_v19, %v2159_v47  ;;  %vm983_vm13 = vweird.f32 %v1712_v19  ;;  %v1630_v47 = vld [vmem:[%s2430_s5] sm:$0xff]  ;;  %v694_v51 = vld [vmem:[%s2070_s14 + $0xb8] sm:$0xff]  ;;  %s1631_s5 = sshll.u32 %s1847_s28, 6 }
 0x199   : > { %v939_v1 = vsub.f32 1.0, %v938_v60  ;;  %v871_v8 = vmul.f32 %v870_v61, %v846_v58  ;;  %v910_v27 = vsel %vm907_vm12, %v909_v7, %v905_v14  ;;  %vm984_vm15 = vmor %vm982_vm14, %vm983_vm13  ;;  %v989_v44 = vor.u32 1.1754944e-38, %v988_v33  ;;  %v684_v14 = vld [vmem:[%s2070_s14 + $0x68] sm:$0xff]  ;;  %v1155_v33 = vld [vmem:[%s2432_s7] sm:$0xf]  ;;  %s1731_s7 = sshra.s32 %s1378_s4, 4  ;;  %s1732_s7 = int_to_ptr.hbm [resolvable:$true] %s1731_s7 }
 0x19a   : > { %v979_v30 = vsub.f32 1.0, %v978_v26  ;;  %v911_v10 = vmul.f32 %v910_v27, %v886_v21  ;;  %v829_v58 = vmul.f32 0.5, %v2091_v4  ;;  %v679_v4 = vld [vmem:[%s2070_s14 + $0x40] sm:$0xff]  ;;  %vm1294_vm9 = vcmask 1043456   ;;  %p1738_p1 = scmp.lt.s32.totalorder %s1732_s7, %s2406_s12 }
 0x19b   : > { %v940_v9 = vmul.f32 %v1710_v48, %v939_v1  ;;  %v1599_v24 = vclamps-f32 %v871_v8, 1.0  ;;  %v678_v1 = vld [vmem:[%s2070_s14 + $0x38] sm:$0xff] }
 0x19c   : > { %v980_v37 = vmul.f32 %v1712_v19, %v979_v30  ;;  %v1600_v43 = vclamps-f32 %v911_v10, 1.0  ;;  %v682_v8 = vld [vmem:[%s2070_s14 + $0x58] sm:$0xff] }
 0x19d   : > { %v941_v18 = vadd.f32 %v1710_v48, %v940_v9  ;;  %v994_v36 = vadd.f32 1.0, %v1599_v24  ;;  %709 = vxpose.xlu2.b32.cont [7/16] (narrow) %v677_v52, 16  ;;  %v700_v9 = vld [vmem:[%s2070_s14 + $0xe8] sm:$0xff]  ;;  %s1737_s14 = scalar_lea.hbm %s2406_s12, 64 }
 0x19e   : > { %v981_v42 = vadd.f32 %v1712_v19, %v980_v37  ;;  %v995_v50 = vadd.f32 1.0, %v1600_v43  ;;  %742 = vxpose.xlu0.b32.cont [8/16] (narrow) %v694_v51, 16  ;;  %v1076_v43 = vld [vmem:[%s2243_s1 + $0x88] sm:$0xff] }
 0x19f   : > { %v945_v25 = vsel %vm944_vm10, %v1710_v48, %v941_v18  ;;  %v998_v45 = vmul.f32 %v994_v36, %v826_v38  ;;  %v1007_v18 = vpop.permute.xlu2 %1006 }
 0x1a0   : > { %v950_v28 = vsel %vm947_vm11, %v949_v23, %v945_v25  ;;  %v985_v48 = vsel %vm984_vm15, %v1712_v19, %v981_v42  ;;  %v999_v60 = vmul.f32 %v995_v50, %v827_v57  ;;  %v1156_v19 = vld [vmem:[%s2431_s8] sm:$0xff]  ;;  %v1060_v50 = vld [vmem:[%s2243_s1 + $0x8] sm:$0xff]  ;;  %vm1290_vm11 = vcmask 64512   ;;  %s1733_s8 = scalar_lea.hbm %s1732_s7, 32 }
 0x1a1   : > { %v951_v29 = vmul.f32 %v950_v28, %v926_v22  ;;  %v990_v53 = vsel %vm987_vm0, %v989_v44, %v985_v48  ;;  %1163 = vperm.xlu1 %1703, %v1156_v19   ;;  %v1059_v44 = vld [vmem:[%s2243_s1] sm:$0xff]  ;;  %p1734_p12 = scmp.ne.s32.totalorder %s1732_s7, %s1733_s8  ;;  %p1739_p2 = scmp.lt.s32.totalorder %s1737_s14, %s1733_s8 }
 0x1a2   : > { %v991_v3 = vmul.f32 %v990_v53, %v966_v62 }
 0x1a3   : > { %v1601_v34 = vclamps-f32 %v951_v29, 1.0  ;;  %p1735_p13 = pnand %p1734_p12, %p1972_p4  ;;  %p1740_p3 = por %p1739_p2, %p1738_p1 }
 0x1a4   : > { %v1602_v11 = vclamps-f32 %v991_v3, 1.0 }
 0x1a5   : > { %v996_v56 = vadd.f32 1.0, %v1601_v34  ;;  %710 = vxpose.xlu2.b32.cont [8/16] (narrow) %v678_v1, 16  ;;  %p1736_p0 = pneg %p1735_p13 }
 0x1a6   : > { %v997_v59 = vadd.f32 1.0, %v1602_v11  ;;  %743 = vxpose.xlu0.b32.cont [9/16] (narrow) %v695_v20, 16 }
 0x1a7   : > { %v1000_v46 = vmul.f32 %v996_v56, %v828_v41  ;;  %v1012_v7 = vpop.permute.xlu2 %1011  ;;  %v1075_v41 = vld [vmem:[%s2243_s1 + $0x80] sm:$0xff]  ;;  %p1741_p5 = pnand %p1740_p3, %p1736_p0 }
 0x1a8   : > { %v1001_v61 = vmul.f32 %v997_v59, %v829_v58  ;;  %v1077_v58 = vld [vmem:[%s2243_s1 + $0x90] sm:$0xff] }
 0x1a9   : > { %v1002_v49 = vpack.c.bf16 %v1000_v46, %v998_v45 }
 0x1aa   : > { %v1003_v0 = vpack.c.bf16 %v1001_v61, %v999_v60 }
 0x1ab   : > { %1030 = vmatpush.bf16.msra.mxu2 %v1002_v49 }
 0x1ac   : > { %1044 = vmatpush.bf16.msra.mxu3 %v1003_v0 }
 0x1ad   : > { %711 = vxpose.xlu2.b32.cont [9/16] (narrow) %v679_v4, 16 }
 0x1ae   : > { %1607 = vmatmul.msk.bf16.vlgmr.msra.gmra.mxu2 %vm1019_vm1, %v1630_v47  ;;  %744 = vxpose.xlu0.b32.cont [10/16] (narrow) %v696_v54, 16 }
 0x1af   : > { %1608 = vmatmul.msk.bf16.vlgmr.msra.gmra.mxu3 %vm1019_vm1, %v1630_v47 }
 0x1b5   : > { %712 = vxpose.xlu2.b32.cont [10/16] (narrow) %v680_v63, 16 }
 0x1b6   : > { %745 = vxpose.xlu0.b32.cont [11/16] (narrow) %v697_v55, 16 }
 0x1bd   : > { %713 = vxpose.xlu2.b32.cont [11/16] (narrow) %v681_v5, 16 }
 0x1be   : > { %746 = vxpose.xlu0.b32.cont [12/16] (narrow) %v698_v2, 16 }
 0x1c5   : > { %714 = vxpose.xlu2.b32.cont [12/16] (narrow) %v682_v8, 16 }
 0x1c6   : > { %747 = vxpose.xlu0.b32.cont [13/16] (narrow) %v699_v6, 16 }
 0x1cd   : > { %715 = vxpose.xlu2.b32.cont [13/16] (narrow) %v683_v12, 16 }
 0x1ce   : > { %748 = vxpose.xlu0.b32.cont [14/16] (narrow) %v700_v9, 16 }
 0x1d5   : > { %716 = vxpose.xlu2.b32.cont [14/16] (narrow) %v684_v14, 16 }
 0x1d6   : > { %749 = vxpose.xlu0.b32.cont [15/16] (narrow) %v701_v13, 16  ;;  %1123 = vxpose.xlu1.b32.start [1/16] (narrow) %v1075_v41, 8 }
 0x1dd   : > { %717 = vxpose.xlu2.b32.cont [15/16] (narrow) %v685_v16, 16 }
 0x1de   : > { %750 = vxpose.xlu0.b32.end [16/16] (narrow) %v702_v15, 16  ;;  %1124 = vxpose.xlu1.b32.cont [2/16] (narrow) %v1076_v43, 8  ;;  %v1078_v15 = vld [vmem:[%s2243_s1 + $0x98] sm:$0xff]  ;;  %v1063_v43 = vld [vmem:[%s2243_s1 + $0x20] sm:$0xff] }
 0x1e5   : > { %718 = vxpose.xlu2.b32.end [16/16] (narrow) %v686_v17, 16 }
 0x1e6   : > { %1125 = vxpose.xlu1.b32.cont [3/16] (narrow) %v1077_v58, 8 }
 0x1ed   : > { %1091 = vxpose.xlu2.b32.start [1/16] (narrow) %v1059_v44, 8 }
 0x1ee   : > { %1126 = vxpose.xlu1.b32.cont [4/16] (narrow) %v1078_v15, 8 }
 0x1f5   : > { %1092 = vxpose.xlu2.b32.cont [2/16] (narrow) %v1060_v50, 8 }
 0x206   : > { %v719_v22 = vpop.trf.xlu2 }
 0x20a   : > { %v751_v27 = vpop.trf.xlu0 }
 0x20e   : > { %v720_v26 = vpop.trf.xlu2 }
 0x212   : > { %v752_v36 = vpop.trf.xlu0 }
 0x213   : > { %v1164_v40 = vpop.permute.xlu1 %1163 }
 0x231   : > { %v1032_v23 = vpop.f32.mrf.mxu2 }
 0x232   : > { %v1033_v24 = vadd.f32 %v1032_v23, %v1007_v18  ;;  %v1046_v21 = vpop.f32.mrf.mxu3 }
 0x233   : > { %v1047_v29 = vadd.f32 %v1046_v21, %v1007_v18  ;;  %v1079_v21 = vld [vmem:[%s2243_s1 + $0xa0] sm:$0xff] }
 0x234   : > { %v1051_v25 = vadd.f32 %v1033_v24, %v719_v22  ;;  %v1061_v22 = vld [vmem:[%s2243_s1 + $0x10] sm:$0xff]  ;;  %1127 = vxpose.xlu1.b32.cont [5/16] (narrow) %v1079_v21, 8 }
 0x235   : > { %v1052_v31 = vadd.f32 %v1047_v29, %v751_v27  ;;  %1093 = vxpose.xlu2.b32.cont [3/16] (narrow) %v1061_v22, 8  ;;  %v1084_v22 = vld [vmem:[%s2243_s1 + $0xc8] sm:$0xff] }
 0x236   : > { %1055 = vst [vmem:[%s2227_s24] sm:$0xff] %v1051_v25 }
 0x237   : > { %1056 = vst [vmem:[%s2227_s24 + $0x8] sm:$0xff] %v1052_v31 }
 0x239   : > { %v1034_v28 = vpop.f32.mrf.mxu2 }
 0x23a   : > { %v1035_v30 = vadd.f32 %v1034_v28, %v1012_v7  ;;  %v1048_v34 = vpop.f32.mrf.mxu3 }
 0x23b   : > { %v1049_v37 = vadd.f32 %v1048_v34, %v1012_v7 }
 0x23c   : > { %v1053_v10 = vadd.f32 %v1035_v30, %v720_v26 }
 0x23d   : > { %v1054_v38 = vadd.f32 %v1049_v37, %v752_v36  ;;  %v1080_v37 = vld [vmem:[%s2243_s1 + $0xa8] sm:$0xff] }
 0x23e   : > { %v1159_v32 = vpack.c.bf16 %v1053_v10, %v1051_v25  ;;  %1057 = vst [vmem:[%s2227_s24 + $0x10] sm:$0xff] %v1053_v10  ;;  %1128 = vxpose.xlu1.b32.cont [6/16] (narrow) %v1080_v37, 8 }
 0x23f   : > { %1058 = vst [vmem:[%s2227_s24 + $0x18] sm:$0xff] %v1054_v38  ;;  %v1160_v39 = vpack.c.bf16 %v1054_v38, %v1052_v31  ;;  %v1062_v31 = vld [vmem:[%s2243_s1 + $0x18] sm:$0xff]  ;;  %v1158_v38 = vld [vmem:[%s2434_s10] sm:$0xff] }
 0x240   : > { %1176 = vmatpush.bf16.msrb.mxu2 %v1159_v32  ;;  %1094 = vxpose.xlu2.b32.cont [4/16] (narrow) %v1062_v31, 8 }
 0x241   : > { %1189 = vmatpush.bf16.msrb.mxu3 %v1160_v39 }
 0x243   : > { %1609 = vmatmul.msk.bf16.vlgmr.msrb.gmra.mxu2 %vm1019_vm1, %v1155_v33 }
 0x244   : > { %1610 = vmatmul.msk.bf16.vlgmr.msrb.gmra.mxu3 %vm1019_vm1, %v1155_v33 }
 0x245   : > { %1704 = vset.pattern.permute.xlu0 %v1857_v35 }
 0x248   : > { %1095 = vxpose.xlu2.b32.cont [5/16] (narrow) %v1063_v43, 8 }
 0x24c   : > { %1287 = vperm.xlu0 %1704, %v1158_v38  }
 0x2c6   : > { %v1178_v56 = vpop.f32.mrf.mxu2 }
 0x2c7   : > { %v2246_v42 = vadd.f32 %v1178_v56, %v1164_v40  ;;  %v1191_v46 = vpop.f32.mrf.mxu3 }
 0x2c8   : > { %v2255_v49 = vadd.f32 %v1191_v46, %v1164_v40 }
 0x2c9   : > { %v2249_v62 = vmul.f32 0.70710677, %v2246_v42 }
 0x2ca   : > { %v2258_v11 = vmul.f32 0.70710677, %v2255_v49 }
 0x2cb   : > { %v1199_v35 = vmul.f32 %v2249_v62, %v2249_v62 }
 0x2cc   : > { %v1239_v57 = vmul.f32 %v2258_v11, %v2258_v11 }
 0x2cd   : > { %v1200_v45 = vmin.f32 %v1199_v35, 16.0 }
 0x2ce   : > { %v1180_v48 = vpop.f32.mrf.mxu2  ;;  %v2264_v60 = vmin.f32 %v1239_v57, 16.0 }
 0x2cf   : > { %v1201_v53 = vmul.f32 2.1237322e-06, %v1200_v45  ;;  %v1212_v3 = vmul.f32 3.8918573e-05, %v1200_v45  ;;  %v1193_v61 = vpop.f32.mrf.mxu3 }
 0x2d0   : > { %v1241_v1 = vmul.f32 2.1237322e-06, %v2264_v60  ;;  %v1252_v54 = vmul.f32 3.8918573e-05, %v2264_v60 }
 0x2d1   : > { %v1202_v47 = vadd.f32 0.00028619796, %v1201_v53  ;;  %v1213_v51 = vadd.f32 0.001143296, %v1212_v3 }
 0x2d2   : > { %v1242_v55 = vadd.f32 0.00028619796, %v1241_v1  ;;  %v1253_v63 = vadd.f32 0.001143296, %v1252_v54  ;;  %v1195_v1 = vmul.f32 0.5, %v2246_v42 }
 0x2d3   : > { %v1203_v52 = vmul.f32 %v1202_v47, %v1200_v45  ;;  %v1214_v59 = vmul.f32 %v1213_v51, %v1200_v45 }
 0x2d4   : > { %v1254_v6 = vmul.f32 %v1253_v63, %v2264_v60  ;;  %v1243_v8 = vmul.f32 %v1242_v55, %v2264_v60 }
 0x2d5   : > { %v1215_v0 = vadd.f32 0.014752088, %v1214_v59  ;;  %v1204_v20 = vadd.f32 0.0036580483, %v1203_v52  ;;  %v1081_v52 = vld [vmem:[%s2243_s1 + $0xb0] sm:$0xff] }
 0x2d6   : > { %v1255_v13 = vadd.f32 0.014752088, %v1254_v6  ;;  %v1244_v16 = vadd.f32 0.0036580483, %v1243_v8  ;;  %1129 = vxpose.xlu1.b32.cont [7/16] (narrow) %v1081_v52, 8  ;;  %v1082_v8 = vld [vmem:[%s2243_s1 + $0xb8] sm:$0xff] }
 0x2d7   : > { %v1216_v4 = vmul.f32 %v1215_v0, %v1200_v45  ;;  %v1205_v5 = vmul.f32 %v1204_v20, %v1200_v45 }
 0x2d8   : > { %v1256_v18 = vmul.f32 %v1255_v13, %v2264_v60  ;;  %v1245_v24 = vmul.f32 %v1244_v16, %v2264_v60  ;;  %v1157_v13 = vld [vmem:[%s2435_s9] sm:$0xf] }
 0x2d9   : > { %v1217_v2 = vadd.f32 0.112945676, %v1216_v4  ;;  %v1206_v14 = vadd.f32 0.05243302, %v1205_v5 }
 0x2da   : > { %v1257_v19 = vadd.f32 0.112945676, %v1256_v18  ;;  %v1246_v28 = vadd.f32 0.05243302, %v1245_v24 }
 0x2db   : > { %v1218_v9 = vmul.f32 %v1217_v2, %v1200_v45  ;;  %v1207_v23 = vmul.f32 %v1206_v14, %v1200_v45  ;;  %v1196_v14 = vmul.f32 0.5, %v2255_v49  ;;  %v1067_v49 = vld [vmem:[%s2243_s1 + $0x40] sm:$0xff] }
 0x2dc   : > { %v1258_v25 = vmul.f32 %v1257_v19, %v2264_v60  ;;  %v1247_v34 = vmul.f32 %v1246_v28, %v2264_v60  ;;  %v1066_v19 = vld [vmem:[%s2243_s1 + $0x38] sm:$0xff] }
 0x2dd   : > { %v1219_v12 = vadd.f32 0.4994258, %v1218_v9  ;;  %v1208_v27 = vadd.f32 0.18741608, %v1207_v23 }
 0x2de   : > { %v1259_v26 = vadd.f32 0.4994258, %v1258_v25  ;;  %v1248_v35 = vadd.f32 0.18741608, %v1247_v34  ;;  %1130 = vxpose.xlu1.b32.cont [8/16] (narrow) %v1082_v8, 8 }
 0x2df   : > { %v1220_v17 = vmul.f32 %v1219_v12, %v1200_v45  ;;  %v1209_v10 = vmul.f32 %v1208_v27, %v1200_v45 }
 0x2e0   : > { %v1260_v29 = vmul.f32 %v1259_v26, %v2264_v60  ;;  %v1249_v3 = vmul.f32 %v1248_v35, %v2264_v60 }
 0x2e1   : > { %v1221_v7 = vadd.f32 1.0, %v1220_v17  ;;  %v1210_v40 = vadd.f32 1.1283791, %v1209_v10  ;;  %v1083_v17 = vld [vmem:[%s2243_s1 + $0xc0] sm:$0xff] }
 0x2e2   : > { %v1261_v33 = vadd.f32 1.0, %v1260_v29  ;;  %v1250_v61 = vadd.f32 1.1283791, %v1249_v3 }
 0x2e3   : > { %1713 = vrcp.f32 %v1221_v7  ;;  %v1233_v39 = vand.u32 2147483648, %v1221_v7  ;;  %v1231_v56 = vand.u32 2147483647, %v1221_v7  ;;  %vm1227_vm3 = vweird.f32 %v1221_v7 }
 0x2e4   : > { %1715 = vrcp.f32 %v1261_v33  ;;  %v1211_v48 = vmul.f32 %v1210_v40, %v2249_v62  ;;  %v1273_v59 = vand.u32 2147483648, %v1261_v33  ;;  %v1271_v20 = vand.u32 2147483647, %v1261_v33  ;;  %v1064_v62 = vld [vmem:[%s2243_s1 + $0x28] sm:$0xff] }
 0x2e5   : > { %v1234_v45 = vor.u32 1.1754944e-38, %v1233_v39  ;;  %vm1232_vm5 = vcmp.eq.f32.partialorder %v1231_v56, 8.507059e+37  ;;  %vm1267_vm7 = vweird.f32 %v1261_v33  ;;  %1096 = vxpose.xlu2.b32.cont [6/16] (narrow) %v1064_v62, 8  ;;  %v1251_v63 = vmul.f32 %v1250_v61, %v2258_v11  ;;  %v1065_v11 = vld [vmem:[%s2243_s1 + $0x30] sm:$0xff] }
 0x2e6   : > { %v1274_v55 = vor.u32 1.1754944e-38, %v1273_v59  ;;  %vm1272_vm10 = vcmp.eq.f32.partialorder %v1271_v20, 8.507059e+37  ;;  %1131 = vxpose.xlu1.b32.cont [9/16] (narrow) %v1083_v17, 8 }
 0x2e9   : > { %v1714_v30 = vpop.eup %1713 }
 0x2ea   : > { %v1223_v32 = vmul.f32 %v1714_v30, %v1221_v7  ;;  %vm1228_vm2 = vweird.f32 %v1714_v30  ;;  %v1716_v46 = vpop.eup %1715 }
 0x2eb   : > { %vm1229_vm4 = vmor %vm1227_vm3, %vm1228_vm2  ;;  %v1263_v50 = vmul.f32 %v1716_v46, %v1261_v33  ;;  %vm1268_vm6 = vweird.f32 %v1716_v46 }
 0x2ec   : > { %v1224_v36 = vsub.f32 1.0, %v1223_v32  ;;  %vm1269_vm8 = vmor %vm1267_vm7, %vm1268_vm6 }
 0x2ed   : > { %v1264_v57 = vsub.f32 1.0, %v1263_v50  ;;  %1097 = vxpose.xlu2.b32.cont [7/16] (narrow) %v1065_v11, 8 }
 0x2ee   : > { %v1225_v41 = vmul.f32 %v1714_v30, %v1224_v36  ;;  %1132 = vxpose.xlu1.b32.cont [10/16] (narrow) %v1084_v22, 8 }
 0x2ef   : > { %v1265_v0 = vmul.f32 %v1716_v46, %v1264_v57 }
 0x2f0   : > { %v1226_v44 = vadd.f32 %v1714_v30, %v1225_v41 }
 0x2f1   : > { %v1266_v4 = vadd.f32 %v1716_v46, %v1265_v0 }
 0x2f2   : > { %v1230_v53 = vsel %vm1229_vm4, %v1714_v30, %v1226_v44 }
 0x2f3   : > { %v1235_v47 = vsel %vm1232_vm5, %v1234_v45, %v1230_v53  ;;  %v1270_v2 = vsel %vm1269_vm8, %v1716_v46, %v1266_v4 }
 0x2f4   : > { %v1236_v51 = vmul.f32 %v1235_v47, %v1211_v48  ;;  %v1275_v6 = vsel %vm1272_vm10, %v1274_v55, %v1270_v2 }
 0x2f5   : > { %v1276_v9 = vmul.f32 %v1275_v6, %v1251_v63  ;;  %1098 = vxpose.xlu2.b32.cont [8/16] (narrow) %v1066_v19, 8 }
 0x2f6   : > { %v1611_v58 = vclamps-f32 %v1236_v51, 1.0 }
 0x2f7   : > { %v1612_v12 = vclamps-f32 %v1276_v9, 1.0 }
 0x2f8   : > { %v1279_v54 = vadd.f32 1.0, %v1611_v58 }
 0x2f9   : > { %v1280_v15 = vadd.f32 1.0, %v1612_v12 }
 0x2fa   : > { %v1281_v60 = vmul.f32 %v1279_v54, %v1195_v1 }
 0x2fb   : > { %v1282_v16 = vmul.f32 %v1280_v15, %v1196_v14 }
 0x2fc   : > { %v1283_v5 = vpack.c.bf16 %v1281_v60, %v1281_v60 }
 0x2fd   : > { %v1284_v18 = vpack.c.bf16 %v1282_v16, %v1282_v16  ;;  %1099 = vxpose.xlu2.b32.cont [9/16] (narrow) %v1067_v49, 8 }
 0x2fe   : > { %v1296_v42 = vsel %vm1294_vm9, %v1283_v5, 0 }
 0x2ff   : > { %1308 = vmatpush.bf16.msrb.mxu0 %v1296_v42  ;;  %v1299_v7 = vsel %vm1294_vm9, %v1284_v18, 0 }
 0x300   : > { %1321 = vmatpush.bf16.msrb.mxu1 %v1299_v7 }
 0x302   : > { %1613 = vmatmul.msk.bf16.vlgmr.msrb.gmra.mxu0 %vm1290_vm11, %v1157_v13 }
 0x303   : > { %1614 = vmatmul.msk.bf16.vlgmr.msrb.gmra.mxu1 %vm1290_vm11, %v1157_v13 }
 0x304   : > { %1744 = shalt.err (!%p1741_p5)
}
 0x305   : > { %s1858_s22 = smov 256   ;;  %s1859_s24 = smov 16   ;;  %v1085_v23 = vld [vmem:[%s2243_s1 + $0xd0] sm:$0xff]  ;;  %v1068_v24 = vld [vmem:[%s2243_s1 + $0x48] sm:$0xff] }
 0x306   : > { %s2437_s9 = scalar_lea.sflag [#allocation5], %s2308_s3  ;;  %s1355_s7 = scalar_lea.hbm %s2405_s11, %s1631_s5  ;;  %1133 = vxpose.xlu1.b32.cont [11/16] (narrow) %v1085_v23, 8 }
 0x307   : > { %1635 = dma.vmem_to_hbm [thread:$0]  (%p1972_p4), %s1376_s17, 512, %s1378_s4, %s2437_s9, %s1858_s22, %s1858_s22, %s1859_s24  }
 0x308   : > { %s1358_s8 = sshll.u32 %s1355_s7, 4  ;;  %s1332_s14 = scalar_lea.sflag [#allocation3], %s2032_s15  ;;  %s1359_s8 = int_to_ptr.hbm [resolvable:$true] %s1358_s8 }
 0x309   : > { %s1759_s0 = sshra.s32 %s1359_s8, 4  ;;  %s1765_s9 = scalar_lea.hbm %s2405_s11, 128  ;;  %s1760_s0 = int_to_ptr.hbm [resolvable:$true] %s1759_s0 }
 0x30a   : > { %s1761_s19 = scalar_lea.hbm %s1760_s0, 64  ;;  %p1766_p10 = scmp.lt.s32.totalorder %s1760_s0, %s2405_s11 }
 0x30b   : > { %p1762_p6 = scmp.ne.s32.totalorder %s1760_s0, %s1761_s19  ;;  %p1767_p11 = scmp.lt.s32.totalorder %s1765_s9, %s1761_s19 }
 0x30d   : > { %p1763_p7 = pnand %p1762_p6, %p1972_p4  ;;  %p1768_p12 = por %p1767_p11, %p1766_p10 }
 0x30f   : > { %p1764_p9 = pneg %p1763_p7 }
 0x311   : > { %p1769_p13 = pnand %p1768_p12, %p1764_p9 }
 0x313   : > { %1772 = shalt.err (!%p1769_p13)
}
 0x314   : > { %1634 = dma.vmem_to_hbm [thread:$0]  (%p1972_p4), %s1357_s6, 1024, %s1359_s8, %s1332_s14, %s1858_s22, %s1858_s22, %s1859_s24   ;;  %1100 = vxpose.xlu2.b32.cont [10/16] (narrow) %v1068_v24, 8  ;;  %v1288_v34 = vpop.permute.xlu0 %1287 }
 0x315   : > { %v1086_v25 = vld [vmem:[%s2243_s1 + $0xd8] sm:$0xff]  ;;  %v1069_v27 = vld [vmem:[%s2243_s1 + $0x50] sm:$0xff]  ;;  %v1087_v26 = vld [vmem:[%s2243_s1 + $0xe0] sm:$0xff]  ;;  %s1586_s5 = sshll.u32 %s2032_s15, 4  ;;  %s1633_s6 = sshll.u32 %s1847_s28, 4 }
 0x316   : > { %1134 = vxpose.xlu1.b32.cont [12/16] (narrow) %v1086_v25, 8  ;;  %v1070_v21 = vld [vmem:[%s2243_s1 + $0x58] sm:$0xff]  ;;  %v1088_v28 = vld [vmem:[%s2243_s1 + $0xe8] sm:$0xff]  ;;  %v1071_v29 = vld [vmem:[%s2243_s1 + $0x60] sm:$0xff]  ;;  %s532_s10 = scalar_lea.vmem [#allocation6], %s1586_s5  ;;  %s1393_s2 = scalar_lea.hbm %s2407_s13, %s1633_s6 }
 0x317   : > { %v1089_v30 = vld [vmem:[%s2243_s1 + $0xf0] sm:$0xff]  ;;  %v1072_v31 = vld [vmem:[%s2243_s1 + $0x68] sm:$0xff]  ;;  %v1090_v10 = vld [vmem:[%s2243_s1 + $0xf8] sm:$0xff]  ;;  %s1395_s7 = sshll.u32 %s532_s10, 4  ;;  %s1793_s0 = scalar_lea.hbm %s2407_s13, 32  ;;  %s1396_s7 = int_to_ptr.vmem [resolvable:$true] %s1395_s7 }
 0x318   : > { %v1073_v32 = vld [vmem:[%s2243_s1 + $0x70] sm:$0xff]  ;;  %v1074_v33 = vld [vmem:[%s2243_s1 + $0x78] sm:$0xff]  ;;  %s1397_s1 = sshll.u32 %s1393_s2, 4  ;;  %s1398_s1 = int_to_ptr.hbm [resolvable:$true] %s1397_s1 }
 0x319   : > { %s1787_s15 = sshra.s32 %s1398_s1, 4  ;;  %s1788_s15 = int_to_ptr.hbm [resolvable:$true] %s1787_s15 }
 0x31a   : > { %s1789_s28 = scalar_lea.hbm %s1788_s15, 16  ;;  %p1794_p3 = scmp.lt.s32.totalorder %s1788_s15, %s2407_s13 }
 0x31b   : > { %p1790_p0 = scmp.ne.s32.totalorder %s1788_s15, %s1789_s28  ;;  %p1795_p5 = scmp.lt.s32.totalorder %s1793_s0, %s1789_s28 }
 0x31c   : > { %1101 = vxpose.xlu2.b32.cont [11/16] (narrow) %v1069_v27, 8 }
 0x31d   : > { %p1791_p1 = pnand %p1790_p0, %p1972_p4  ;;  %p1796_p6 = por %p1795_p5, %p1794_p3 }
 0x31e   : > { %1135 = vxpose.xlu1.b32.cont [13/16] (narrow) %v1087_v26, 8 }
 0x31f   : > { %p1792_p2 = pneg %p1791_p1 }
 0x321   : > { %p1797_p7 = pnand %p1796_p6, %p1792_p2 }
 0x324   : > { %1102 = vxpose.xlu2.b32.cont [12/16] (narrow) %v1070_v21, 8 }
 0x326   : > { %1136 = vxpose.xlu1.b32.cont [14/16] (narrow) %v1088_v28, 8 }
 0x32c   : > { %1103 = vxpose.xlu2.b32.cont [13/16] (narrow) %v1071_v29, 8 }
 0x32e   : > { %1137 = vxpose.xlu1.b32.cont [15/16] (narrow) %v1089_v30, 8 }
 0x334   : > { %1104 = vxpose.xlu2.b32.cont [14/16] (narrow) %v1072_v31, 8 }
 0x336   : > { %1138 = vxpose.xlu1.b32.end [16/16] (narrow) %v1090_v10, 8 }
 0x33c   : > { %1105 = vxpose.xlu2.b32.cont [15/16] (narrow) %v1073_v32, 8 }
 0x344   : > { %1106 = vxpose.xlu2.b32.end [16/16] (narrow) %v1074_v33, 8 }
 0x362   : > { %v1139_v56 = vpop.trf.xlu1 }
 0x365   : > { %v1107_v37 = vpop.trf.xlu2 }
 0x37f   : > { %v1310_v36 = vpop.f32.mrf.mxu0 }
 0x380   : > { %v1311_v38 = vadd.f32 %v1310_v36, %v1288_v34  ;;  %v1323_v41 = vpop.f32.mrf.mxu1 }
 0x381   : > { %v1324_v35 = vadd.f32 %v1323_v41, %v1288_v34 }
 0x382   : > { %v1327_v39 = vadd.f32 %v1311_v38, %v1107_v37 }
 0x383   : > { %v1328_v43 = vadd.f32 %v1324_v35, %v1139_v56 }
 0x384   : > { %1329 = vst [vmem:[%s532_s10] sm:$0xff] %v1327_v39 }
 0x385   : > { %1330 = vst [vmem:[%s532_s10 + $0x8] sm:$0xff] %v1328_v43 }
 0x387   : > { %v1312_v40 = vpop.f32.mrf.mxu0 }
 0x388   : > { %1800 = shalt.err (!%p1797_p7)
}
 0x389   : > { %s2438_s9 = scalar_lea.sflag [#allocation5], %s2308_s3  ;;  %v1325_v44 = vpop.f32.mrf.mxu1 }
 0x38a   : > { %1636 = dma.vmem_to_hbm [thread:$0]  (%p1972_p4), %s1396_s7, 256, %s1398_s1, %s2438_s9  }
 0x38b PF: > { %p1650_p9 = scmp.ge.s32.totalorder %s1855_s30, 2  ;;  %s1409_s17 = sand.u32 1, %s1835_s25  }
 0x38c   : > { %s1410_s23 = scalar_lea.sflag [#allocation3], %s1409_s17 }
 0x38d   : > { %p1641_p10 = pnand %p1650_p9, %p1981_p8 }
 0x38f   : > { %p1642_p11 = pneg %p1641_p10 }
 0x391   : > { %1826 = dma.done.wait (%p1642_p11), %s1410_s23, 1024  }
 0x392   : > { %1828 = vsyncadd (%p1642_p11), %s1410_s23, 4294966272  ;;  %s2439_s5 = sadd.s32 4294967294, %s1855_s30  }
 0x393   : > { %s1419_s6 = sand.u32 1, %s2439_s5  }
 0x394   : > { %s1420_s18 = scalar_lea.sflag [#allocation5], %s1419_s6 }
 0x395   : > { %1830 = dma.done.wait (%p1642_p11), %s1420_s18, 768  }
 0x396   : > { %1832 = vsyncadd (%p1642_p11), %s1420_s18, 4294966528  ;;  %s30_s30 = sadd.s32 1, %s1855_s30   ;;  %s2440_s25 = smov %s1839_s26 }
 0x397   : > { %p27_p4 = scmp.ge.s32.totalorder %s30_s30, 4   ;;  %s2441_s26 = smov %s1843_s27 }
 0x398   : > { %s2442_s27 = smov %s1987_s21  ;;  %s2443_s28 = smov %s1851_s29 }
 0x399   : > { %s2444_s29 = smov %s2446_s16  ;;  %29 = sbr.rel (!%p27_p4) target bundleno = 18 (0x12), region = 137 }
 0x39e   :  { %1436 = vsyncpa [#allocation3], 1 }
 0x39f   :  { %1438 = vsyncpa [#allocation3 + $0x1], 1 }
 0x3a0   :  { %1439 = vsyncpa [#allocation5], 1 }
 0x3a1   :  { %1441 = vsyncpa [#allocation5 + $0x1], 1 }

</bundles_post_ra>
